<compile_context>
chip_gen: v5e
topology: v5e:2x2
jax: 0.10.0
libtpu: 0.0.40
codegen_flags: <defaults>
</compile_context>

<pallas_src>
import functools
import math

import numpy as np
import jax
import jax.numpy as jnp
from jax import lax
from jax.experimental import pallas as pl
from jax.experimental.pallas import tpu as pltpu


def _round_up(n, m):
    return (n + m - 1) // m * m


def _erf(x):
    # Abramowitz & Stegun 7.1.26 (max abs err ~1.5e-7): matches torch's exact
    # erf-based GELU well inside the 1e-4 test tolerance.
    a1, a2, a3, a4, a5 = 0.254829592, -0.284496736, 1.421413741, -1.453152027, 1.061405429
    p = 0.3275911
    ax = jnp.abs(x)
    d = 1.0 + p * ax
    # approx reciprocal runs on the EUP (idle slot); one Newton step restores
    # ~f32 accuracy far cheaper than the exact divide chain on the VALU.
    t = pl.reciprocal(d, approx=True)
    t = t * (2.0 - d * t)
    poly = ((((a5 * t + a4) * t + a3) * t + a2) * t + a1) * t
    y = 1.0 - poly * jnp.exp(-ax * ax)
    return jnp.where(x >= 0.0, y, -y)


def _gelu_exact(x):
    # exact (erf-based) GELU, same as torch.nn.functional.gelu default
    return 0.5 * x * (1.0 + _erf(x * 0.7071067811865476))


def feedforward_kernel(x_mid_ref, x_up_ref, x_dn_ref, w1_ref, wd_ref, w2_ref,
                       o_ref, h1_ref, *, TH, W):
    # x_mid_ref : (TH*W, C)   this tile's rows, spatially flattened (natural C)
    # x_up_ref  : (W,    C)   row above the tile (clamped at the image edge)
    # x_dn_ref  : (W,    C)   row below the tile (clamped at the image edge)
    # w1_ref    : (C,  Fp)    conv1 weight (torch weight[:, :, 0, 0].T, hid padded)
    # wd_ref    : (9,  Fp)    depthwise 3x3 weight, tap index = ky*3 + kx
    # w2_ref    : (Fp, C)     conv2 weight (torch weight[:, :, 0, 0].T)
    # o_ref     : (TH*W, C)   natural-C output block
    # h1_ref    : ((TH+2)*W, Fp) VMEM scratch: GELU(conv1) with a 1-row halo
    t = pl.program_id(1)
    nt = pl.num_programs(1)

    w1 = w1_ref[...]

    # ---- pointwise conv1 (1x1) + GELU, written straight into the Fp-wide
    # halo-padded activation scratch (no x staging copy).  Halo rows at the
    # image boundary are zeroed: no bias and GELU(0)=0 reproduce the depthwise
    # conv's zero padding exactly.
    h1_ref[pl.ds(W, TH * W), :] = _gelu_exact(
        jnp.dot(x_mid_ref[...], w1, preferred_element_type=jnp.float32))

    up_keep = (t > 0).astype(jnp.float32)
    dn_keep = (t < nt - 1).astype(jnp.float32)
    h1_ref[pl.ds(0, W), :] = up_keep * _gelu_exact(
        jnp.dot(x_up_ref[...], w1, preferred_element_type=jnp.float32))
    h1_ref[pl.ds((TH + 1) * W, W), :] = dn_keep * _gelu_exact(
        jnp.dot(x_dn_ref[...], w1, preferred_element_type=jnp.float32))

    # ---- depthwise 3x3 conv, padding=1 -----------------------------------
    # Rows are flattened (h, w): a +/-1 shift along the row axis is the W
    # neighbour; the H neighbour is a W-aligned static slice of the padded
    # scratch.  Column edge masks are built once at shape (rows, 1).
    rows = (TH + 2) * W
    h1 = h1_ref[...]
    col = lax.broadcasted_iota(jnp.int32, (rows, 1), 0) % W
    h1_l = pltpu.roll(h1, 1, 0) * (col > 0).astype(jnp.float32)          # value at col j-1
    h1_r = pltpu.roll(h1, rows - 1, 0) * (col < W - 1).astype(jnp.float32)  # value at col j+1

    wd = wd_ref[...]
    wtap = [wd[k:k + 1, :] for k in range(9)]   # hoisted (1, Fp) tap rows

    acc = None
    for dh in (-1, 0, 1):
        start = (1 + dh) * W                    # W-aligned static slice start
        for dw, src in ((-1, h1_l), (0, h1), (1, h1_r)):
            term = src[start:start + TH * W, :] * wtap[(dh + 1) * 3 + (dw + 1)]
            acc = term if acc is None else acc + term
    h2 = _gelu_exact(acc)

    # ---- pointwise conv2 (1x1) back to dim, natural-C output --------------
    o_ref[...] = jnp.dot(h2, w2_ref[...],
                         preferred_element_type=jnp.float32).astype(o_ref.dtype)


def _choose_tile_h(B, H, W, C, Fp, budget_bytes=22 * 1024 * 1024):
    # Approximate f32 bytes of live data per image row inside one grid step:
    #   ~5 Fp-wide row copies (halo activation scratch, h1_l, h1_r, acc/h2,
    #   slack for compiler temps) + ~6 C-wide row copies (double-buffered
    #   input and output blocks, slack).  Live target ~22 MiB; the pallas_call
    #   requests a 48 MiB scoped-VMEM limit, leaving headroom on every
    #   generation including v7x's 64 MiB.
    per_row = 4 * W * (5 * Fp + 6 * C)
    th = max(1, min(H, budget_bytes // per_row))
    # keep >= ceil(4/B) row tiles so both v7x TensorCores get parallel work
    min_tiles = -(-4 // B)
    th = max(1, min(th, max(1, H // min_tiles)))
    # prefer a divisor of H when one is close (avoids padding H); otherwise
    # keep the VMEM-sized tile and let the wrapper pad H to a multiple.
    div = next(c for c in range(th, 0, -1) if H % c == 0)
    return div if 2 * div >= th else th


def feedforward_pallas(x, w1, wd, w2, *, tile_h=None):
    """x: (B, H, W, C) NHWC float32. Returns (B, H, W, C).

    w1: (C, hid)  conv1 weight (= torch conv1.weight[:, :, 0, 0].T)
    wd: (9, hid)  depthwise 3x3 weight, tap index = ky*3 + kx
    w2: (hid, C)  conv2 weight (= torch conv2.weight[:, :, 0, 0].T)
    """
    B, H, W, C = x.shape
    hid = w1.shape[1]
    assert W % 8 == 0, "W must be a multiple of 8 (TPU sublane tiling)"

    # Lane-pad only the hidden dim of the weights (hid -> Fp).  Exact: no bias
    # anywhere and GELU(0) == 0, so the padded hidden channels stay zero.
    Fp = _round_up(hid, 128)
    w1p = jnp.pad(w1, ((0, 0), (0, Fp - hid)))
    wdp = jnp.pad(wd, ((0, 0), (0, Fp - hid)))
    w2p = jnp.pad(w2, ((0, Fp - hid), (0, 0)))

    if tile_h is None:
        tile_h = _choose_tile_h(B, H, W, C, Fp)
    TH = int(tile_h)
    Hp = _round_up(H, TH)                   # pad H only if TH doesn't divide it
    xh = x if Hp == H else jnp.pad(x, ((0, 0), (0, Hp - H), (0, 0), (0, 0)))
    xf = xh.reshape(B, Hp * W, C)
    nT = Hp // TH

    def mid_map(b, t):                      # this tile's TH rows
        return (b, t, 0)

    def up_map(b, t):                       # single row above the tile (clamped)
        return (b, jnp.maximum(t * TH - 1, 0), 0)

    def dn_map(b, t):                       # single row below the tile (clamped)
        return (b, jnp.minimum(t * TH + TH, Hp - 1), 0)

    def w_map(b, t):                        # grid-invariant weights (no re-fetch)
        return (0, 0)

    out = pl.pallas_call(
        functools.partial(feedforward_kernel, TH=TH, W=W),
        out_shape=jax.ShapeDtypeStruct((B, Hp * W, C), x.dtype),
        grid=(B, nT),
        in_specs=[
            pl.BlockSpec((pl.Squeezed(), TH * W, C), mid_map),
            pl.BlockSpec((pl.Squeezed(), W, C), up_map),
            pl.BlockSpec((pl.Squeezed(), W, C), dn_map),
            pl.BlockSpec((C, Fp), w_map),
            pl.BlockSpec((9, Fp), w_map),
            pl.BlockSpec((Fp, C), w_map),
        ],
        out_specs=pl.BlockSpec((pl.Squeezed(), TH * W, C), mid_map),
        scratch_shapes=[pltpu.VMEM(((TH + 2) * W, Fp), jnp.float32)],
        compiler_params=pltpu.CompilerParams(
            dimension_semantics=("parallel", "parallel"),
            vmem_limit_bytes=48 * 1024 * 1024),
    )(xf, xf, xf, w1p, wdp, w2p)

    out = out.reshape(B, Hp, W, C)
    return out if Hp == H else out[:, :H]


def feedforward_ref(x, w1, wd, w2):
    """Pure-JAX reference (same NHWC semantics as the PyTorch module)."""
    B, H, W, C = x.shape
    hid = w1.shape[1]
    h1 = jax.nn.gelu(jnp.einsum('bhwc,cf->bhwf', x, w1), approximate=False)
    wd3 = wd.reshape(3, 3, hid)
    pad = jnp.pad(h1, ((0, 0), (1, 1), (1, 1), (0, 0)))
    acc = jnp.zeros_like(h1)
    for dh in range(3):
        for dw in range(3):
            acc = acc + pad[:, dh:dh + H, dw:dw + W, :] * wd3[dh, dw][None, None, None, :]
    h2 = jax.nn.gelu(acc, approximate=False)
    return jnp.einsum('bhwf,fc->bhwc', h2, w2)


if __name__ == "__main__":
    B, H, W, dim, mult = 2, 16, 16, 8, 4
    hid = dim * mult

    key = jax.random.PRNGKey(0)
    k1, k2, k3, k4 = jax.random.split(key, 4)

    # deterministic synthetic parameters (shapes match the nn.Conv2d weights):
    #   conv1 : torch (hid, dim, 1, 1)            -> here w1 (dim, hid)
    #   dwconv: torch (hid, 1, 3, 3), groups=hid  -> here wd (9, hid), (ky, kx) major
    #   conv2 : torch (dim, hid, 1, 1)            -> here w2 (hid, dim)
    x = jax.random.normal(k1, (B, H, W, dim), jnp.float32)
    w1 = jax.random.normal(k2, (dim, hid), jnp.float32) * (1.0 / math.sqrt(dim))
    wd = jax.random.normal(k3, (9, hid), jnp.float32) * (1.0 / 3.0)
    w2 = jax.random.normal(k4, (hid, dim), jnp.float32) * (1.0 / math.sqrt(hid))

    ref = feedforward_ref(x, w1, wd, w2)

    # tile_h=4 exercises the inter-tile halo path, tile_h=5 the non-divisible-H
    # (row padding) path, tile_h=None the VMEM-budgeted auto tile.
    for th in (4, 5, None):
        out = jax.block_until_ready(feedforward_pallas(x, w1, wd, w2, tile_h=th))
        np.testing.assert_allclose(np.asarray(out), np.asarray(ref),
                                   atol=1e-4, rtol=1e-4)
    print("KERNEL_OK")
</pallas_src>

<mosaic_0001>
module attributes {stable_mosaic.version = 11 : i64} {
  func.func @feedforward_kernel(%arg0: i32, %arg1: i32, %arg2: memref<1x64x8xf32, #tpu.memory_space<vmem>>, %arg3: memref<1x16x8xf32, #tpu.memory_space<vmem>>, %arg4: memref<1x16x8xf32, #tpu.memory_space<vmem>>, %arg5: memref<8x128xf32, #tpu.memory_space<vmem>>, %arg6: memref<9x128xf32, #tpu.memory_space<vmem>>, %arg7: memref<128x8xf32, #tpu.memory_space<vmem>>, %arg8: memref<1x64x8xf32, #tpu.memory_space<vmem>>, %arg9: memref<96x128xf32, #tpu.memory_space<vmem>>) attributes {dimension_semantics = [#tpu.dimension_semantics<parallel>, #tpu.dimension_semantics<parallel>], iteration_bounds = array<i64: 2, 4>, scalar_prefetch = 0 : i64, scratch_operands = 1 : i64, tpu.core_type = #tpu.core_type<tc>, window_params = [{transform_indices = @transform_0, window_bounds = array<i64: 1, 64, 8>}, {transform_indices = @transform_1, window_bounds = array<i64: 1, 16, 8>}, {transform_indices = @transform_2, window_bounds = array<i64: 1, 16, 8>}, {pipeline_mode = #tpu.pipeline_mode<synchronous>, transform_indices = @transform_3, window_bounds = array<i64: 8, 128>}, {pipeline_mode = #tpu.pipeline_mode<synchronous>, transform_indices = @transform_4, window_bounds = array<i64: 9, 128>}, {pipeline_mode = #tpu.pipeline_mode<synchronous>, transform_indices = @transform_5, window_bounds = array<i64: 128, 8>}, {transform_indices = @transform_6, window_bounds = array<i64: 1, 64, 8>}]} {
    %c0 = arith.constant 0 : index
    %c0_0 = arith.constant 0 : index
    %0 = vector.load %arg5[%c0, %c0_0] : memref<8x128xf32, #tpu.memory_space<vmem>>, vector<8x128xf32>
    %c0_1 = arith.constant 0 : index
    %c0_2 = arith.constant 0 : index
    %c0_3 = arith.constant 0 : index
    %1 = vector.load %arg2[%c0_1, %c0_2, %c0_3] : memref<1x64x8xf32, #tpu.memory_space<vmem>>, vector<1x64x8xf32>
    %2 = vector.shape_cast %1 : vector<1x64x8xf32> to vector<64x8xf32>
    %cst = arith.constant dense<0.000000e+00> : vector<64x128xf32>
    %3 = tpu.matmul %2, %0, %cst {dimension_numbers = #tpu.dot_dimension_numbers<[1], [0], [0], [1], [0, 0, 1, 1], [], []>} : vector<64x8xf32>, vector<8x128xf32>, vector<64x128xf32> -> vector<64x128xf32>
    %cst_4 = arith.constant 5.000000e-01 : f32
    %4 = vector.broadcast %cst_4 : f32 to vector<64x128xf32>
    %5 = arith.mulf %4, %3 : vector<64x128xf32>
    %cst_5 = arith.constant 0.707106769 : f32
    %6 = vector.broadcast %cst_5 : f32 to vector<64x128xf32>
    %7 = arith.mulf %3, %6 : vector<64x128xf32>
    %8 = math.absf %7 : vector<64x128xf32>
    %cst_6 = arith.constant 0.327591091 : f32
    %9 = vector.broadcast %cst_6 : f32 to vector<64x128xf32>
    %10 = arith.mulf %9, %8 : vector<64x128xf32>
    %cst_7 = arith.constant 1.000000e+00 : f32
    %11 = vector.broadcast %cst_7 : f32 to vector<64x128xf32>
    %12 = arith.addf %11, %10 : vector<64x128xf32>
    %13 = tpu.reciprocal %12 {approx = true} : vector<64x128xf32> -> vector<64x128xf32>
    %14 = arith.mulf %12, %13 : vector<64x128xf32>
    %cst_8 = arith.constant 2.000000e+00 : f32
    %15 = vector.broadcast %cst_8 : f32 to vector<64x128xf32>
    %16 = arith.subf %15, %14 : vector<64x128xf32>
    %17 = arith.mulf %13, %16 : vector<64x128xf32>
    %cst_9 = arith.constant 1.06140542 : f32
    %18 = vector.broadcast %cst_9 : f32 to vector<64x128xf32>
    %19 = arith.mulf %18, %17 : vector<64x128xf32>
    %cst_10 = arith.constant -1.45315206 : f32
    %20 = vector.broadcast %cst_10 : f32 to vector<64x128xf32>
    %21 = arith.addf %19, %20 : vector<64x128xf32>
    %22 = arith.mulf %21, %17 : vector<64x128xf32>
    %cst_11 = arith.constant 1.42141378 : f32
    %23 = vector.broadcast %cst_11 : f32 to vector<64x128xf32>
    %24 = arith.addf %22, %23 : vector<64x128xf32>
    %25 = arith.mulf %24, %17 : vector<64x128xf32>
    %cst_12 = arith.constant -0.284496725 : f32
    %26 = vector.broadcast %cst_12 : f32 to vector<64x128xf32>
    %27 = arith.addf %25, %26 : vector<64x128xf32>
    %28 = arith.mulf %27, %17 : vector<64x128xf32>
    %cst_13 = arith.constant 0.254829586 : f32
    %29 = vector.broadcast %cst_13 : f32 to vector<64x128xf32>
    %30 = arith.addf %28, %29 : vector<64x128xf32>
    %31 = arith.mulf %30, %17 : vector<64x128xf32>
    %cst_14 = arith.constant 0.000000e+00 : f32
    %32 = vector.broadcast %cst_14 : f32 to vector<64x128xf32>
    %33 = arith.subf %32, %8 : vector<64x128xf32>
    %34 = arith.mulf %33, %8 : vector<64x128xf32>
    %35 = math.exp %34 : vector<64x128xf32>
    %36 = arith.mulf %31, %35 : vector<64x128xf32>
    %cst_15 = arith.constant 1.000000e+00 : f32
    %37 = vector.broadcast %cst_15 : f32 to vector<64x128xf32>
    %38 = arith.subf %37, %36 : vector<64x128xf32>
    %cst_16 = arith.constant 0.000000e+00 : f32
    %39 = vector.broadcast %cst_16 : f32 to vector<64x128xf32>
    %40 = arith.cmpf oge, %7, %39 : vector<64x128xf32>
    %cst_17 = arith.constant 0.000000e+00 : f32
    %41 = vector.broadcast %cst_17 : f32 to vector<64x128xf32>
    %42 = arith.subf %41, %38 : vector<64x128xf32>
    %43 = arith.select %40, %38, %42 : vector<64x128xi1>, vector<64x128xf32>
    %cst_18 = arith.constant 1.000000e+00 : f32
    %44 = vector.broadcast %cst_18 : f32 to vector<64x128xf32>
    %45 = arith.addf %44, %43 : vector<64x128xf32>
    %46 = arith.mulf %5, %45 : vector<64x128xf32>
    %c16 = arith.constant 16 : index
    %c0_19 = arith.constant 0 : index
    %47 = vector.load %arg9[%c16, %c0_19] : memref<96x128xf32, #tpu.memory_space<vmem>>, vector<64x128xf32>
    tpu.vector_store %arg9[%c16, %c0_19], %46 {strides = array<i32>} : memref<96x128xf32, #tpu.memory_space<vmem>>, vector<64x128xf32>,
    %c0_i32 = arith.constant 0 : i32
    %48 = arith.cmpi sgt, %arg1, %c0_i32 : i32
    %49 = arith.extui %48 : i1 to i32
    %50 = arith.sitofp %49 : i32 to f32
    %c3_i32 = arith.constant 3 : i32
    %51 = arith.cmpi slt, %arg1, %c3_i32 : i32
    %52 = arith.extui %51 : i1 to i32
    %53 = arith.sitofp %52 : i32 to f32
    %c0_20 = arith.constant 0 : index
    %c0_21 = arith.constant 0 : index
    %c0_22 = arith.constant 0 : index
    %54 = vector.load %arg3[%c0_20, %c0_21, %c0_22] : memref<1x16x8xf32, #tpu.memory_space<vmem>>, vector<1x16x8xf32>
    %55 = vector.shape_cast %54 : vector<1x16x8xf32> to vector<16x8xf32>
    %cst_23 = arith.constant dense<0.000000e+00> : vector<16x128xf32>
    %56 = tpu.matmul %55, %0, %cst_23 {dimension_numbers = #tpu.dot_dimension_numbers<[1], [0], [0], [1], [0, 0, 1, 1], [], []>} : vector<16x8xf32>, vector<8x128xf32>, vector<16x128xf32> -> vector<16x128xf32>
    %cst_24 = arith.constant 5.000000e-01 : f32
    %57 = vector.broadcast %cst_24 : f32 to vector<16x128xf32>
    %58 = arith.mulf %57, %56 : vector<16x128xf32>
    %cst_25 = arith.constant 0.707106769 : f32
    %59 = vector.broadcast %cst_25 : f32 to vector<16x128xf32>
    %60 = arith.mulf %56, %59 : vector<16x128xf32>
    %61 = math.absf %60 : vector<16x128xf32>
    %cst_26 = arith.constant 0.327591091 : f32
    %62 = vector.broadcast %cst_26 : f32 to vector<16x128xf32>
    %63 = arith.mulf %62, %61 : vector<16x128xf32>
    %cst_27 = arith.constant 1.000000e+00 : f32
    %64 = vector.broadcast %cst_27 : f32 to vector<16x128xf32>
    %65 = arith.addf %64, %63 : vector<16x128xf32>
    %66 = tpu.reciprocal %65 {approx = true} : vector<16x128xf32> -> vector<16x128xf32>
    %67 = arith.mulf %65, %66 : vector<16x128xf32>
    %cst_28 = arith.constant 2.000000e+00 : f32
    %68 = vector.broadcast %cst_28 : f32 to vector<16x128xf32>
    %69 = arith.subf %68, %67 : vector<16x128xf32>
    %70 = arith.mulf %66, %69 : vector<16x128xf32>
    %cst_29 = arith.constant 1.06140542 : f32
    %71 = vector.broadcast %cst_29 : f32 to vector<16x128xf32>
    %72 = arith.mulf %71, %70 : vector<16x128xf32>
    %cst_30 = arith.constant -1.45315206 : f32
    %73 = vector.broadcast %cst_30 : f32 to vector<16x128xf32>
    %74 = arith.addf %72, %73 : vector<16x128xf32>
    %75 = arith.mulf %74, %70 : vector<16x128xf32>
    %cst_31 = arith.constant 1.42141378 : f32
    %76 = vector.broadcast %cst_31 : f32 to vector<16x128xf32>
    %77 = arith.addf %75, %76 : vector<16x128xf32>
    %78 = arith.mulf %77, %70 : vector<16x128xf32>
    %cst_32 = arith.constant -0.284496725 : f32
    %79 = vector.broadcast %cst_32 : f32 to vector<16x128xf32>
    %80 = arith.addf %78, %79 : vector<16x128xf32>
    %81 = arith.mulf %80, %70 : vector<16x128xf32>
    %cst_33 = arith.constant 0.254829586 : f32
    %82 = vector.broadcast %cst_33 : f32 to vector<16x128xf32>
    %83 = arith.addf %81, %82 : vector<16x128xf32>
    %84 = arith.mulf %83, %70 : vector<16x128xf32>
    %cst_34 = arith.constant 0.000000e+00 : f32
    %85 = vector.broadcast %cst_34 : f32 to vector<16x128xf32>
    %86 = arith.subf %85, %61 : vector<16x128xf32>
    %87 = arith.mulf %86, %61 : vector<16x128xf32>
    %88 = math.exp %87 : vector<16x128xf32>
    %89 = arith.mulf %84, %88 : vector<16x128xf32>
    %cst_35 = arith.constant 1.000000e+00 : f32
    %90 = vector.broadcast %cst_35 : f32 to vector<16x128xf32>
    %91 = arith.subf %90, %89 : vector<16x128xf32>
    %cst_36 = arith.constant 0.000000e+00 : f32
    %92 = vector.broadcast %cst_36 : f32 to vector<16x128xf32>
    %93 = arith.cmpf oge, %60, %92 : vector<16x128xf32>
    %cst_37 = arith.constant 0.000000e+00 : f32
    %94 = vector.broadcast %cst_37 : f32 to vector<16x128xf32>
    %95 = arith.subf %94, %91 : vector<16x128xf32>
    %96 = arith.select %93, %91, %95 : vector<16x128xi1>, vector<16x128xf32>
    %cst_38 = arith.constant 1.000000e+00 : f32
    %97 = vector.broadcast %cst_38 : f32 to vector<16x128xf32>
    %98 = arith.addf %97, %96 : vector<16x128xf32>
    %99 = arith.mulf %58, %98 : vector<16x128xf32>
    %100 = vector.broadcast %50 : f32 to vector<16x128xf32>
    %101 = arith.mulf %100, %99 : vector<16x128xf32>
    %c0_39 = arith.constant 0 : index
    %c0_40 = arith.constant 0 : index
    %102 = vector.load %arg9[%c0_39, %c0_40] : memref<96x128xf32, #tpu.memory_space<vmem>>, vector<16x128xf32>
    tpu.vector_store %arg9[%c0_39, %c0_40], %101 {strides = array<i32>} : memref<96x128xf32, #tpu.memory_space<vmem>>, vector<16x128xf32>,
    %c0_41 = arith.constant 0 : index
    %c0_42 = arith.constant 0 : index
    %c0_43 = arith.constant 0 : index
    %103 = vector.load %arg4[%c0_41, %c0_42, %c0_43] : memref<1x16x8xf32, #tpu.memory_space<vmem>>, vector<1x16x8xf32>
    %104 = vector.shape_cast %103 : vector<1x16x8xf32> to vector<16x8xf32>
    %cst_44 = arith.constant dense<0.000000e+00> : vector<16x128xf32>
    %105 = tpu.matmul %104, %0, %cst_44 {dimension_numbers = #tpu.dot_dimension_numbers<[1], [0], [0], [1], [0, 0, 1, 1], [], []>} : vector<16x8xf32>, vector<8x128xf32>, vector<16x128xf32> -> vector<16x128xf32>
    %cst_45 = arith.constant 5.000000e-01 : f32
    %106 = vector.broadcast %cst_45 : f32 to vector<16x128xf32>
    %107 = arith.mulf %106, %105 : vector<16x128xf32>
    %cst_46 = arith.constant 0.707106769 : f32
    %108 = vector.broadcast %cst_46 : f32 to vector<16x128xf32>
    %109 = arith.mulf %105, %108 : vector<16x128xf32>
    %110 = math.absf %109 : vector<16x128xf32>
    %cst_47 = arith.constant 0.327591091 : f32
    %111 = vector.broadcast %cst_47 : f32 to vector<16x128xf32>
    %112 = arith.mulf %111, %110 : vector<16x128xf32>
    %cst_48 = arith.constant 1.000000e+00 : f32
    %113 = vector.broadcast %cst_48 : f32 to vector<16x128xf32>
    %114 = arith.addf %113, %112 : vector<16x128xf32>
    %115 = tpu.reciprocal %114 {approx = true} : vector<16x128xf32> -> vector<16x128xf32>
    %116 = arith.mulf %114, %115 : vector<16x128xf32>
    %cst_49 = arith.constant 2.000000e+00 : f32
    %117 = vector.broadcast %cst_49 : f32 to vector<16x128xf32>
    %118 = arith.subf %117, %116 : vector<16x128xf32>
    %119 = arith.mulf %115, %118 : vector<16x128xf32>
    %cst_50 = arith.constant 1.06140542 : f32
    %120 = vector.broadcast %cst_50 : f32 to vector<16x128xf32>
    %121 = arith.mulf %120, %119 : vector<16x128xf32>
    %cst_51 = arith.constant -1.45315206 : f32
    %122 = vector.broadcast %cst_51 : f32 to vector<16x128xf32>
    %123 = arith.addf %121, %122 : vector<16x128xf32>
    %124 = arith.mulf %123, %119 : vector<16x128xf32>
    %cst_52 = arith.constant 1.42141378 : f32
    %125 = vector.broadcast %cst_52 : f32 to vector<16x128xf32>
    %126 = arith.addf %124, %125 : vector<16x128xf32>
    %127 = arith.mulf %126, %119 : vector<16x128xf32>
    %cst_53 = arith.constant -0.284496725 : f32
    %128 = vector.broadcast %cst_53 : f32 to vector<16x128xf32>
    %129 = arith.addf %127, %128 : vector<16x128xf32>
    %130 = arith.mulf %129, %119 : vector<16x128xf32>
    %cst_54 = arith.constant 0.254829586 : f32
    %131 = vector.broadcast %cst_54 : f32 to vector<16x128xf32>
    %132 = arith.addf %130, %131 : vector<16x128xf32>
    %133 = arith.mulf %132, %119 : vector<16x128xf32>
    %cst_55 = arith.constant 0.000000e+00 : f32
    %134 = vector.broadcast %cst_55 : f32 to vector<16x128xf32>
    %135 = arith.subf %134, %110 : vector<16x128xf32>
    %136 = arith.mulf %135, %110 : vector<16x128xf32>
    %137 = math.exp %136 : vector<16x128xf32>
    %138 = arith.mulf %133, %137 : vector<16x128xf32>
    %cst_56 = arith.constant 1.000000e+00 : f32
    %139 = vector.broadcast %cst_56 : f32 to vector<16x128xf32>
    %140 = arith.subf %139, %138 : vector<16x128xf32>
    %cst_57 = arith.constant 0.000000e+00 : f32
    %141 = vector.broadcast %cst_57 : f32 to vector<16x128xf32>
    %142 = arith.cmpf oge, %109, %141 : vector<16x128xf32>
    %cst_58 = arith.constant 0.000000e+00 : f32
    %143 = vector.broadcast %cst_58 : f32 to vector<16x128xf32>
    %144 = arith.subf %143, %140 : vector<16x128xf32>
    %145 = arith.select %142, %140, %144 : vector<16x128xi1>, vector<16x128xf32>
    %cst_59 = arith.constant 1.000000e+00 : f32
    %146 = vector.broadcast %cst_59 : f32 to vector<16x128xf32>
    %147 = arith.addf %146, %145 : vector<16x128xf32>
    %148 = arith.mulf %107, %147 : vector<16x128xf32>
    %149 = vector.broadcast %53 : f32 to vector<16x128xf32>
    %150 = arith.mulf %149, %148 : vector<16x128xf32>
    %c80 = arith.constant 80 : index
    %c0_60 = arith.constant 0 : index
    %151 = vector.load %arg9[%c80, %c0_60] : memref<96x128xf32, #tpu.memory_space<vmem>>, vector<16x128xf32>
    tpu.vector_store %arg9[%c80, %c0_60], %150 {strides = array<i32>} : memref<96x128xf32, #tpu.memory_space<vmem>>, vector<16x128xf32>,
    %c0_61 = arith.constant 0 : index
    %c0_62 = arith.constant 0 : index
    %152 = vector.load %arg9[%c0_61, %c0_62] : memref<96x128xf32, #tpu.memory_space<vmem>>, vector<96x128xf32>
    %153 = tpu.iota {dimensions = array<i32: 0>} : vector<96x1xi32>
    %c16_i32 = arith.constant 16 : i32
    %c0_i32_63 = arith.constant 0 : i32
    %154 = arith.cmpi eq, %c16_i32, %c0_i32_63 : i32
    %c1_i32 = arith.constant 1 : i32
    %155 = arith.select %154, %c1_i32, %c16_i32 : i32
    %156 = vector.broadcast %155 : i32 to vector<96x1xi32>
    %157 = arith.remsi %153, %156 : vector<96x1xi32>
    %c0_i32_64 = arith.constant 0 : i32
    %158 = vector.broadcast %c0_i32_64 : i32 to vector<96x1xi32>
    %159 = arith.cmpi ne, %157, %158 : vector<96x1xi32>
    %c0_i32_65 = arith.constant 0 : i32
    %160 = vector.broadcast %c0_i32_65 : i32 to vector<96x1xi32>
    %161 = arith.cmpi slt, %157, %160 : vector<96x1xi32>
    %c0_i32_66 = arith.constant 0 : i32
    %162 = arith.cmpi slt, %155, %c0_i32_66 : i32
    %163 = vector.broadcast %162 : i1 to vector<96x1xi1>
    %164 = vector.broadcast %163 : vector<96x1xi1> to vector<96x1xi1>
    %165 = arith.xori %161, %164 : vector<96x1xi1>
    %166 = arith.andi %165, %159 : vector<96x1xi1>
    %167 = vector.broadcast %155 : i32 to vector<96x1xi32>
    %168 = arith.addi %157, %167 : vector<96x1xi32>
    %169 = arith.select %166, %168, %157 : vector<96x1xi1>, vector<96x1xi32>
    %c1_i32_67 = arith.constant 1 : i32
    %170 = tpu.dynamic_rotate %152 by %c1_i32_67 dim 0 : vector<96x128xf32>, i32 -> vector<96x128xf32>
    %c0_i32_68 = arith.constant 0 : i32
    %171 = vector.broadcast %c0_i32_68 : i32 to vector<96x1xi32>
    %172 = arith.cmpi sgt, %169, %171 : vector<96x1xi32>
    %173 = arith.extui %172 : vector<96x1xi1> to vector<96x1xi32>
    %174 = arith.sitofp %173 : vector<96x1xi32> to vector<96x1xf32>
    %175 = vector.broadcast %174 : vector<96x1xf32> to vector<96x128xf32>
    %176 = arith.mulf %170, %175 : vector<96x128xf32>
    %c95_i32 = arith.constant 95 : i32
    %177 = tpu.dynamic_rotate %152 by %c95_i32 dim 0 : vector<96x128xf32>, i32 -> vector<96x128xf32>
    %c15_i32 = arith.constant 15 : i32
    %178 = vector.broadcast %c15_i32 : i32 to vector<96x1xi32>
    %179 = arith.cmpi slt, %169, %178 : vector<96x1xi32>
    %180 = arith.extui %179 : vector<96x1xi1> to vector<96x1xi32>
    %181 = arith.sitofp %180 : vector<96x1xi32> to vector<96x1xf32>
    %182 = vector.broadcast %181 : vector<96x1xf32> to vector<96x128xf32>
    %183 = arith.mulf %177, %182 : vector<96x128xf32>
    %c0_69 = arith.constant 0 : index
    %c0_70 = arith.constant 0 : index
    %184 = vector.load %arg6[%c0_69, %c0_70] : memref<9x128xf32, #tpu.memory_space<vmem>>, vector<9x128xf32>
    %185 = vector.extract_strided_slice %184 {offsets = [0, 0], sizes = [1, 128], strides = [1, 1]} : vector<9x128xf32> to vector<1x128xf32>
    %186 = vector.extract_strided_slice %184 {offsets = [1, 0], sizes = [1, 128], strides = [1, 1]} : vector<9x128xf32> to vector<1x128xf32>
    %187 = vector.extract_strided_slice %184 {offsets = [2, 0], sizes = [1, 128], strides = [1, 1]} : vector<9x128xf32> to vector<1x128xf32>
    %188 = vector.extract_strided_slice %184 {offsets = [3, 0], sizes = [1, 128], strides = [1, 1]} : vector<9x128xf32> to vector<1x128xf32>
    %189 = vector.extract_strided_slice %184 {offsets = [4, 0], sizes = [1, 128], strides = [1, 1]} : vector<9x128xf32> to vector<1x128xf32>
    %190 = vector.extract_strided_slice %184 {offsets = [5, 0], sizes = [1, 128], strides = [1, 1]} : vector<9x128xf32> to vector<1x128xf32>
    %191 = vector.extract_strided_slice %184 {offsets = [6, 0], sizes = [1, 128], strides = [1, 1]} : vector<9x128xf32> to vector<1x128xf32>
    %192 = vector.extract_strided_slice %184 {offsets = [7, 0], sizes = [1, 128], strides = [1, 1]} : vector<9x128xf32> to vector<1x128xf32>
    %193 = vector.extract_strided_slice %184 {offsets = [8, 0], sizes = [1, 128], strides = [1, 1]} : vector<9x128xf32> to vector<1x128xf32>
    %194 = vector.extract_strided_slice %176 {offsets = [0, 0], sizes = [64, 128], strides = [1, 1]} : vector<96x128xf32> to vector<64x128xf32>
    %195 = vector.broadcast %185 : vector<1x128xf32> to vector<64x128xf32>
    %196 = arith.mulf %194, %195 : vector<64x128xf32>
    %197 = vector.extract_strided_slice %152 {offsets = [0, 0], sizes = [64, 128], strides = [1, 1]} : vector<96x128xf32> to vector<64x128xf32>
    %198 = vector.broadcast %186 : vector<1x128xf32> to vector<64x128xf32>
    %199 = arith.mulf %197, %198 : vector<64x128xf32>
    %200 = arith.addf %196, %199 : vector<64x128xf32>
    %201 = vector.extract_strided_slice %183 {offsets = [0, 0], sizes = [64, 128], strides = [1, 1]} : vector<96x128xf32> to vector<64x128xf32>
    %202 = vector.broadcast %187 : vector<1x128xf32> to vector<64x128xf32>
    %203 = arith.mulf %201, %202 : vector<64x128xf32>
    %204 = arith.addf %200, %203 : vector<64x128xf32>
    %205 = vector.extract_strided_slice %176 {offsets = [16, 0], sizes = [64, 128], strides = [1, 1]} : vector<96x128xf32> to vector<64x128xf32>
    %206 = vector.broadcast %188 : vector<1x128xf32> to vector<64x128xf32>
    %207 = arith.mulf %205, %206 : vector<64x128xf32>
    %208 = arith.addf %204, %207 : vector<64x128xf32>
    %209 = vector.extract_strided_slice %152 {offsets = [16, 0], sizes = [64, 128], strides = [1, 1]} : vector<96x128xf32> to vector<64x128xf32>
    %210 = vector.broadcast %189 : vector<1x128xf32> to vector<64x128xf32>
    %211 = arith.mulf %209, %210 : vector<64x128xf32>
    %212 = arith.addf %208, %211 : vector<64x128xf32>
    %213 = vector.extract_strided_slice %183 {offsets = [16, 0], sizes = [64, 128], strides = [1, 1]} : vector<96x128xf32> to vector<64x128xf32>
    %214 = vector.broadcast %190 : vector<1x128xf32> to vector<64x128xf32>
    %215 = arith.mulf %213, %214 : vector<64x128xf32>
    %216 = arith.addf %212, %215 : vector<64x128xf32>
    %217 = vector.extract_strided_slice %176 {offsets = [32, 0], sizes = [64, 128], strides = [1, 1]} : vector<96x128xf32> to vector<64x128xf32>
    %218 = vector.broadcast %191 : vector<1x128xf32> to vector<64x128xf32>
    %219 = arith.mulf %217, %218 : vector<64x128xf32>
    %220 = arith.addf %216, %219 : vector<64x128xf32>
    %221 = vector.extract_strided_slice %152 {offsets = [32, 0], sizes = [64, 128], strides = [1, 1]} : vector<96x128xf32> to vector<64x128xf32>
    %222 = vector.broadcast %192 : vector<1x128xf32> to vector<64x128xf32>
    %223 = arith.mulf %221, %222 : vector<64x128xf32>
    %224 = arith.addf %220, %223 : vector<64x128xf32>
    %225 = vector.extract_strided_slice %183 {offsets = [32, 0], sizes = [64, 128], strides = [1, 1]} : vector<96x128xf32> to vector<64x128xf32>
    %226 = vector.broadcast %193 : vector<1x128xf32> to vector<64x128xf32>
    %227 = arith.mulf %225, %226 : vector<64x128xf32>
    %228 = arith.addf %224, %227 : vector<64x128xf32>
    %cst_71 = arith.constant 5.000000e-01 : f32
    %229 = vector.broadcast %cst_71 : f32 to vector<64x128xf32>
    %230 = arith.mulf %229, %228 : vector<64x128xf32>
    %cst_72 = arith.constant 0.707106769 : f32
    %231 = vector.broadcast %cst_72 : f32 to vector<64x128xf32>
    %232 = arith.mulf %228, %231 : vector<64x128xf32>
    %233 = math.absf %232 : vector<64x128xf32>
    %cst_73 = arith.constant 0.327591091 : f32
    %234 = vector.broadcast %cst_73 : f32 to vector<64x128xf32>
    %235 = arith.mulf %234, %233 : vector<64x128xf32>
    %cst_74 = arith.constant 1.000000e+00 : f32
    %236 = vector.broadcast %cst_74 : f32 to vector<64x128xf32>
    %237 = arith.addf %236, %235 : vector<64x128xf32>
    %238 = tpu.reciprocal %237 {approx = true} : vector<64x128xf32> -> vector<64x128xf32>
    %239 = arith.mulf %237, %238 : vector<64x128xf32>
    %cst_75 = arith.constant 2.000000e+00 : f32
    %240 = vector.broadcast %cst_75 : f32 to vector<64x128xf32>
    %241 = arith.subf %240, %239 : vector<64x128xf32>
    %242 = arith.mulf %238, %241 : vector<64x128xf32>
    %cst_76 = arith.constant 1.06140542 : f32
    %243 = vector.broadcast %cst_76 : f32 to vector<64x128xf32>
    %244 = arith.mulf %243, %242 : vector<64x128xf32>
    %cst_77 = arith.constant -1.45315206 : f32
    %245 = vector.broadcast %cst_77 : f32 to vector<64x128xf32>
    %246 = arith.addf %244, %245 : vector<64x128xf32>
    %247 = arith.mulf %246, %242 : vector<64x128xf32>
    %cst_78 = arith.constant 1.42141378 : f32
    %248 = vector.broadcast %cst_78 : f32 to vector<64x128xf32>
    %249 = arith.addf %247, %248 : vector<64x128xf32>
    %250 = arith.mulf %249, %242 : vector<64x128xf32>
    %cst_79 = arith.constant -0.284496725 : f32
    %251 = vector.broadcast %cst_79 : f32 to vector<64x128xf32>
    %252 = arith.addf %250, %251 : vector<64x128xf32>
    %253 = arith.mulf %252, %242 : vector<64x128xf32>
    %cst_80 = arith.constant 0.254829586 : f32
    %254 = vector.broadcast %cst_80 : f32 to vector<64x128xf32>
    %255 = arith.addf %253, %254 : vector<64x128xf32>
    %256 = arith.mulf %255, %242 : vector<64x128xf32>
    %cst_81 = arith.constant 0.000000e+00 : f32
    %257 = vector.broadcast %cst_81 : f32 to vector<64x128xf32>
    %258 = arith.subf %257, %233 : vector<64x128xf32>
    %259 = arith.mulf %258, %233 : vector<64x128xf32>
    %260 = math.exp %259 : vector<64x128xf32>
    %261 = arith.mulf %256, %260 : vector<64x128xf32>
    %cst_82 = arith.constant 1.000000e+00 : f32
    %262 = vector.broadcast %cst_82 : f32 to vector<64x128xf32>
    %263 = arith.subf %262, %261 : vector<64x128xf32>
    %cst_83 = arith.constant 0.000000e+00 : f32
    %264 = vector.broadcast %cst_83 : f32 to vector<64x128xf32>
    %265 = arith.cmpf oge, %232, %264 : vector<64x128xf32>
    %cst_84 = arith.constant 0.000000e+00 : f32
    %266 = vector.broadcast %cst_84 : f32 to vector<64x128xf32>
    %267 = arith.subf %266, %263 : vector<64x128xf32>
    %268 = arith.select %265, %263, %267 : vector<64x128xi1>, vector<64x128xf32>
    %cst_85 = arith.constant 1.000000e+00 : f32
    %269 = vector.broadcast %cst_85 : f32 to vector<64x128xf32>
    %270 = arith.addf %269, %268 : vector<64x128xf32>
    %271 = arith.mulf %230, %270 : vector<64x128xf32>
    %c0_86 = arith.constant 0 : index
    %c0_87 = arith.constant 0 : index
    %272 = vector.load %arg7[%c0_86, %c0_87] : memref<128x8xf32, #tpu.memory_space<vmem>>, vector<128x8xf32>
    %cst_88 = arith.constant dense<0.000000e+00> : vector<64x8xf32>
    %273 = tpu.matmul %271, %272, %cst_88 {dimension_numbers = #tpu.dot_dimension_numbers<[1], [0], [0], [1], [0, 0, 1, 1], [], []>} : vector<64x128xf32>, vector<128x8xf32>, vector<64x8xf32> -> vector<64x8xf32>
    %c0_89 = arith.constant 0 : index
    %c0_90 = arith.constant 0 : index
    %c0_91 = arith.constant 0 : index
    %274 = vector.load %arg8[%c0_89, %c0_90, %c0_91] : memref<1x64x8xf32, #tpu.memory_space<vmem>>, vector<1x64x8xf32>
    %275 = vector.shape_cast %274 : vector<1x64x8xf32> to vector<64x8xf32>
    %276 = vector.shape_cast %273 : vector<64x8xf32> to vector<1x64x8xf32>
    tpu.vector_store %arg8[%c0_89, %c0_90, %c0_91], %276 {strides = array<i32>} : memref<1x64x8xf32, #tpu.memory_space<vmem>>, vector<1x64x8xf32>,
    return
  }
  func.func @transform_0(%arg0: i32, %arg1: i32) -> (i32, i32, i32) {
    %c0_i32 = arith.constant 0 : i32
    %c0_i32_0 = arith.constant 0 : i32
    return %arg0, %arg1, %c0_i32 : i32, i32, i32
  }
  func.func @transform_1(%arg0: i32, %arg1: i32) -> (i32, i32, i32) {
    %c4_i32 = arith.constant 4 : i32
    %0 = arith.muli %arg1, %c4_i32 : i32
    %c1_i32 = arith.constant 1 : i32
    %1 = arith.subi %0, %c1_i32 : i32
    %c0_i32 = arith.constant 0 : i32
    %2 = arith.maxsi %1, %c0_i32 : i32
    %c0_i32_0 = arith.constant 0 : i32
    %c0_i32_1 = arith.constant 0 : i32
    return %arg0, %2, %c0_i32_0 : i32, i32, i32
  }
  func.func @transform_2(%arg0: i32, %arg1: i32) -> (i32, i32, i32) {
    %c4_i32 = arith.constant 4 : i32
    %0 = arith.muli %arg1, %c4_i32 : i32
    %c4_i32_0 = arith.constant 4 : i32
    %1 = arith.addi %0, %c4_i32_0 : i32
    %c15_i32 = arith.constant 15 : i32
    %2 = arith.minsi %1, %c15_i32 : i32
    %c0_i32 = arith.constant 0 : i32
    %c0_i32_1 = arith.constant 0 : i32
    return %arg0, %2, %c0_i32 : i32, i32, i32
  }
  func.func @transform_3(%arg0: i32, %arg1: i32) -> (i32, i32) {
    %c0_i32 = arith.constant 0 : i32
    %c0_i32_0 = arith.constant 0 : i32
    %c0_i32_1 = arith.constant 0 : i32
    return %c0_i32, %c0_i32_0 : i32, i32
  }
  func.func @transform_4(%arg0: i32, %arg1: i32) -> (i32, i32) {
    %c0_i32 = arith.constant 0 : i32
    %c0_i32_0 = arith.constant 0 : i32
    %c0_i32_1 = arith.constant 0 : i32
    return %c0_i32, %c0_i32_0 : i32, i32
  }
  func.func @transform_5(%arg0: i32, %arg1: i32) -> (i32, i32) {
    %c0_i32 = arith.constant 0 : i32
    %c0_i32_0 = arith.constant 0 : i32
    %c0_i32_1 = arith.constant 0 : i32
    return %c0_i32, %c0_i32_0 : i32, i32
  }
  func.func @transform_6(%arg0: i32, %arg1: i32) -> (i32, i32, i32) {
    %c0_i32 = arith.constant 0 : i32
    %c0_i32_0 = arith.constant 0 : i32
    return %arg0, %arg1, %c0_i32 : i32, i32, i32
  }
}

</mosaic_0001>

<bundles_post_ra>
// kernel: tpu_custom_call.1
= control target key start
LH: loop header
LB: loop body
LE: loop exit
PB: predicated region body
PF: predicated region fallthrough
CT: control target
= control target key end

     0   :  { %s2096_s21 = smov 0   ;;  %s2098_s22 = smov 0   ;;  %s3151_s0 = inlined_call_operand.vmem [shape: f32[2,256,8], index: 0, kind: input, shape index: {}]   ;;  %s3152_s1 = inlined_call_operand.vmem [shape: f32[2,256,8], index: 1, kind: input, shape index: {}]   ;;  %s3153_s2 = inlined_call_operand.vmem [shape: f32[2,256,8], index: 2, kind: input, shape index: {}]   ;;  %s3154_s3 = inlined_call_operand.vmem [shape: f32[8,128], index: 3, kind: input, shape index: {}]   ;;  %s3155_s4 = inlined_call_operand.vmem [shape: f32[9,128], index: 4, kind: input, shape index: {}]   ;;  %s3156_s5 = inlined_call_operand.vmem [shape: f32[128,8], index: 5, kind: input, shape index: {}]   ;;  %s3157_s6 = inlined_call_operand.vmem [shape: f32[2,256,8], index: 6, kind: output, shape index: {}]  }
   0x1   :  { %s2100_s23 = smov 0   ;;  %s2102_s24 = smov 0  }
   0x2   :  { %s2104_s25 = smov 0  }
   0x3 LB: > { %s25_s26 = sadd.s32 1, %s2050_s23  ;;  %s28_s27 = sadd.s32 1, %s2054_s24  ;;  %s2058_s25 = sphi %s2104_s25, %s16_s25   ;;  %s2054_s24 = sphi %s2102_s24, %s3213_s24   ;;  %s2050_s23 = sphi %s2100_s23, %s3212_s23   ;;  %s2046_s22 = sphi %s2098_s22, %s3211_s22   ;;  %s2042_s21 = sphi %s2096_s21, %s3210_s21  }
   0x4   : > { %p26_p0 = scmp.ge.s32.totalorder %s25_s26, 4  ;;  %p1823_p1 = scmp.ge.s32.totalorder %s2058_s25, 1 }
   0x5   : > { %p299_p2 = scmp.lt.s32.totalorder %s2058_s25, 9 }
   0x6   : > { %s3215_s26 = smov (%p26_p0, %s25_s26), 0  ;;  %s3217_s27 = smov (!%p26_p0, %s28_s27), %s2054_s24 }
   0x7   : > { %p300_p3 = pnand %p1823_p1, %p299_p2  ;;  %p30_p4 = scmp.ge.s32.totalorder %s3217_s27, 2 }
   0x9   : > { %s3219_s27 = smov (%p30_p4, %s3217_s27), 0  ;;  %303 = sbr.rel (%p300_p3) target bundleno = 536 (0x218), region = 44 }
   0xe   : > { %v419_v0 = vld [vmem:[%s3154_s3] sm:$0xff]  ;;  %s1824_s30 = sshll.u32 %s2042_s21, 3  ;;  %p364_p5 = scmp.lt.s32.totalorder %s2046_s22, 1  ;;  %vm428_vm0 = vcmask 64512  }
   0xf   : > { %468 = vmatpush.msra.mxu0 %v419_v0  ;;  %1865 = vmatpush.msra.mxu2 %v419_v0  ;;  %p366_p6 = scmp.lt.s32.totalorder %s1824_s30, 31  ;;  %s1827_s7 = sshll.u32 %s2042_s21, 2 }
  0x10   : > { %s3221_s22 = smov (!%p364_p5, %s2046_s22), 1  ;;  %763 = vmatpush.msra.mxu1 %v419_v0  ;;  %s1828_s9 = sadd.s32 4294967295, %s1827_s7 }
  0x11   : > { %857 = vmatpush.msrb.mxu2 %v419_v0  ;;  %s3223_s30 = smov (!%p366_p6, %s1824_s30), 31  ;;  %s1825_s8 = sshll.u32 %s3221_s22, 5 }
  0x12   : > { %s369_s10 = sadd.s32 %s1825_s8, %s3223_s30  ;;  %p375_p7 = scmp.gt.s32.totalorder %s1828_s9, 0 }
  0x13   : > { %s2133_s11 = sshll.u32 %s369_s10, 3  ;;  %s392_s12 = sadd.s32 4, %s1827_s7 }
  0x14   : > { %s2139_s15 = scalar_lea.vmem %s3151_s0, %s2133_s11  ;;  %p393_p8 = scmp.lt.s32.totalorder %s392_s12, 15 }
  0x15   : > { %v420_v1 = vld [vmem:[%s2139_s15] sm:$0xff]  ;;  %v427_v2 = vld [vmem:[%s2139_s15 + $0x38] sm:$0xff]  ;;  %s3225_s9 = smov (!%p375_p7, %s1828_s9), 0  ;;  %v421_v3 = vld [vmem:[%s2139_s15 + $0x8] sm:$0xff]  ;;  %p734_p11 = scmp.gt.s32.totalorder %s2042_s21, 0 }
  0x16   : > { %1839 = vmatmul.msk.f32.vlgmr.msra.gmra.mxu0 %vm428_vm0, %v420_v1  ;;  %1846 = vmatmul.msk.f32.vlgmr.msra.gmra.mxu2 %vm428_vm0, %v427_v2  ;;  %s3227_s12 = smov (!%p393_p8, %s392_s12), 15  ;;  %s1829_s16 = sshll.u32 %s3225_s9, 1  ;;  %v422_v6 = vld [vmem:[%s2139_s15 + $0x10] sm:$0xff]  ;;  %v423_v9 = vld [vmem:[%s2139_s15 + $0x18] sm:$0xff]  ;;  %v424_v10 = vld [vmem:[%s2139_s15 + $0x20] sm:$0xff] }
  0x17   : > { %p380_p9 = scmp.lt.s32.totalorder %s1829_s16, 31  ;;  %s1833_s17 = sshll.u32 %s3227_s12, 1  ;;  %v425_v11 = vld [vmem:[%s2139_s15 + $0x28] sm:$0xff]  ;;  %v426_v12 = vld [vmem:[%s2139_s15 + $0x30] sm:$0xff] }
  0x18   : > { %p398_p10 = scmp.lt.s32.totalorder %s1833_s17, 31  ;;  %p737_p12 = scmp.lt.s32.totalorder %s2042_s21, 3 }
  0x19   : > { %s3229_s16 = smov (!%p380_p9, %s1829_s16), 31 }
  0x1a   : > { %s3231_s17 = smov (!%p398_p10, %s1833_s17), 31  ;;  %s383_s18 = sadd.s32 %s1825_s8, %s3229_s16 }
  0x1b   : > { %s1831_s19 = sshll.u32 %s383_s18, 3  ;;  %s401_s20 = sadd.s32 %s1825_s8, %s3231_s17 }
  0x1c   : > { %s385_s29 = scalar_lea.vmem %s3152_s1, %s1831_s19  ;;  %s1835_s30 = sshll.u32 %s401_s20, 3 }
  0x1d   : > { %v740_v4 = vld [vmem:[%s385_s29] sm:$0xff]  ;;  %s403_s10 = scalar_lea.vmem %s3153_s2, %s1835_s30  ;;  %v741_v7 = vld [vmem:[%s385_s29 + $0x8] sm:$0xff]  ;;  %s417_s16 = scalar_lea.vmem %s3157_s6, %s2133_s11 }
  0x1e   : > { %1840 = vmatmul.msk.f32.gmra.mxu0 %vm428_vm0, %v421_v3  ;;  %1847 = vmatmul.msk.f32.vlgmr.msra.gmra.mxu1 %vm428_vm0, %v740_v4  ;;  %v834_v5 = vld [vmem:[%s403_s10] sm:$0xff]  ;;  %v835_v8 = vld [vmem:[%s403_s10 + $0x8] sm:$0xff]  ;;  %s2266_s8 = scalar_select %p734_p11, 1, 0 }
  0x1f   : > { %1849 = vmatmul.msk.f32.vlgmr.msrb.gmra.mxu2 %vm428_vm0, %v834_v5  ;;  %s2348_s15 = scalar_select %p737_p12, 1, 0 }
  0x20   : > { %s736_s14 = scvt.s32.f32 %s2266_s8 }
  0x21   : > { %s739_s21 = scvt.s32.f32 %s2348_s15 }
  0x26   : > { %1841 = vmatmul.msk.f32.gmra.mxu0 %vm428_vm0, %v422_v6  ;;  %1848 = vmatmul.msk.f32.gmra.mxu1 %vm428_vm0, %v741_v7 }
  0x27   : > { %1850 = vmatmul.msk.f32.gmra.mxu2 %vm428_vm0, %v835_v8 }
  0x2e   : > { %1842 = vmatmul.msk.f32.gmra.mxu0 %vm428_vm0, %v423_v9 }
  0x36   : > { %1843 = vmatmul.msk.f32.gmra.mxu0 %vm428_vm0, %v424_v10 }
  0x3e   : > { %1844 = vmatmul.msk.f32.gmra.mxu0 %vm428_vm0, %v425_v11 }
  0x46   : > { %1845 = vmatmul.msk.f32.gmra.mxu0 %vm428_vm0, %v426_v12 }
  0x93   : > { %v470_v13 = vpop.f32.mrf.mxu0 }
  0x94   : > { %v2167_v14 = vmul.f32 0.70710677, %v470_v13  ;;  %v2221_v6 = vmul.f32 0.5, %v470_v13 }
  0x96   : > { %v510_v15 = vand.u32 2147483647, %v2167_v14  ;;  %vm686_vm1 = vcmp.ge.f32.partialorder %v2167_v14, 0.0 }
  0x98   : > { %v518_v16 = vmul.f32 0.3275911, %v510_v15  ;;  %v638_v41 = vsub.f32 0.0, %v510_v15 }
  0x99   : > { %v2170_v17 = vpop.f32.mrf.mxu2 }
  0x9a   : > { %v526_v18 = vadd.f32 1.0, %v518_v16  ;;  %v2173_v19 = vmul.f32 0.70710677, %v2170_v17  ;;  %v646_v52 = vmul.f32 %v638_v41, %v510_v15 }
  0x9b   : > { %v2175_v20 = vpop.f32.mrf.mxu0  ;;  %v2180_v22 = vpop.f32.mrf.mxu1 }
  0x9c   : > { %1940 = vrcp.f32 %v526_v18  ;;  %v2178_v21 = vand.u32 2147483647, %v2173_v19  ;;  %v2183_v23 = vmul.f32 0.70710677, %v2175_v20  ;;  %v2187_v25 = vmul.f32 0.70710677, %v2180_v22 }
  0x9d   : > { %v654_v2 = vmul.f32 1.442695, %v646_v52  ;;  %vm693_vm6 = vcmp.ge.f32.partialorder %v2173_v19, 0.0 }
  0x9e   : > { %v525_v24 = vmul.f32 0.3275911, %v2178_v21  ;;  %v511_v26 = vand.u32 2147483647, %v2183_v23  ;;  %v775_v28 = vand.u32 2147483647, %v2187_v25 }
  0x9f   : > { %v645_v63 = vsub.f32 0.0, %v2178_v21  ;;  %vm687_vm2 = vcmp.ge.f32.partialorder %v2183_v23, 0.0  ;;  %vm819_vm3 = vcmp.ge.f32.partialorder %v2187_v25, 0.0 }
  0xa0   : > { %v533_v27 = vadd.f32 1.0, %v525_v24  ;;  %v519_v29 = vmul.f32 0.3275911, %v511_v26  ;;  %v777_v31 = vmul.f32 0.3275911, %v775_v28  ;;  %v639_v60 = vsub.f32 0.0, %v511_v26 }
  0xa1   : > { %v807_v3 = vsub.f32 0.0, %v775_v28 }
  0xa2   : > { %v1941_v30 = vpop.eup %1940  ;;  %1942 = vrcp.f32 %v533_v27  ;;  %v527_v33 = vadd.f32 1.0, %v519_v29  ;;  %v779_v34 = vadd.f32 1.0, %v777_v31  ;;  %v2193_v37 = vpop.f32.mrf.mxu2  ;;  %v647_v11 = vmul.f32 %v639_v60, %v511_v26 }
  0xa3   : > { %v542_v32 = vmul.f32 %v1941_v30, %v526_v18  ;;  %v2191_v36 = vpop.f32.mrf.mxu1  ;;  %v2204_v43 = vmul.f32 0.70710677, %v2193_v37  ;;  %v2217_v1 = vpop.f32.mrf.mxu0  ;;  %v653_v18 = vmul.f32 %v645_v63, %v2178_v21  ;;  %v809_v29 = vmul.f32 %v807_v3, %v775_v28 }
  0xa4   : > { %1944 = vrcp.f32 %v527_v33  ;;  %v2196_v38 = vmul.f32 0.70710677, %v2191_v36  ;;  %v2228_v12 = vmul.f32 0.70710677, %v2217_v1 }
  0xa5   : > { %v550_v35 = vsub.f32 2.0, %v542_v32  ;;  %1946 = vrcp.f32 %v779_v34  ;;  %v2209_v47 = vand.u32 2147483647, %v2204_v43  ;;  %vm913_vm10 = vcmp.ge.f32.partialorder %v2204_v43, 0.0 }
  0xa6   : > { %v2201_v42 = vand.u32 2147483647, %v2196_v38  ;;  %vm820_vm7 = vcmp.ge.f32.partialorder %v2196_v38, 0.0  ;;  %vm688_vm12 = vcmp.ge.f32.partialorder %v2228_v12, 0.0 }
  0xa7   : > { %v2198_v39 = vmul.f32 %v1941_v30, %v550_v35  ;;  %v871_v55 = vmul.f32 0.3275911, %v2209_v47  ;;  %v656_v35 = vmul.f32 1.442695, %v647_v11 }
  0xa8   : > { %v1943_v40 = vpop.eup %1942  ;;  %v778_v46 = vmul.f32 0.3275911, %v2201_v42 }
  0xa9   : > { %v566_v44 = vmul.f32 1.0614054, %v2198_v39  ;;  %v549_v45 = vmul.f32 %v1943_v40, %v533_v27  ;;  %v873_v5 = vadd.f32 1.0, %v871_v55  ;;  %v2234_v27 = vmul.f32 0.5, %v2170_v17 }
  0xaa   : > { %v1945_v48 = vpop.eup %1944  ;;  %v780_v54 = vadd.f32 1.0, %v778_v46  ;;  %v811_v46 = vmul.f32 1.442695, %v809_v29  ;;  %v940_v29 = vlaneseq }
  0xab   : > { %v574_v49 = vadd.f32 -1.4531521, %v566_v44  ;;  %v557_v50 = vsub.f32 2.0, %v549_v45  ;;  %v1947_v51 = vpop.eup %1946  ;;  %v543_v53 = vmul.f32 %v1945_v48, %v527_v33  ;;  %v2238_v33 = vmul.f32 0.5, %v2175_v20 }
  0xac   : > { %v783_v58 = vmul.f32 %v1947_v51, %v779_v34  ;;  %1948 = vrcp.f32 %v780_v54  ;;  %v668_v44 = vmul.f32 1.442695, %v653_v18  ;;  %v808_v20 = vsub.f32 0.0, %v2201_v42 }
  0xad   : > { %v582_v56 = vmul.f32 %v574_v49, %v2198_v39  ;;  %v2213_v57 = vmul.f32 %v1943_v40, %v557_v50  ;;  %v551_v59 = vsub.f32 2.0, %v543_v53  ;;  %1950 = vrcp.f32 %v873_v5 }
  0xae   : > { %v785_v0 = vsub.f32 2.0, %v783_v58  ;;  %1952 = vpow2.f32 %v654_v2  ;;  %v2242_v40 = vand.u32 2147483647, %v2228_v12 }
  0xaf   : > { %v590_v61 = vadd.f32 1.4214138, %v582_v56  ;;  %v573_v62 = vmul.f32 1.0614054, %v2213_v57  ;;  %v2219_v4 = vmul.f32 %v1945_v48, %v551_v59  ;;  %1954 = vpow2.f32 %v656_v35 }
  0xb0   : > { %v2224_v9 = vmul.f32 %v1947_v51, %v785_v0  ;;  %v520_v58 = vmul.f32 0.3275911, %v2242_v40  ;;  %1956 = vpow2.f32 %v811_v46 }
  0xb1   : > { %v598_v7 = vmul.f32 %v590_v61, %v2198_v39  ;;  %v581_v8 = vadd.f32 -1.4531521, %v573_v62  ;;  %v567_v10 = vmul.f32 1.0614054, %v2219_v4  ;;  %1958 = vpow2.f32 %v668_v44 }
  0xb2   : > { %v789_v13 = vmul.f32 1.0614054, %v2224_v9  ;;  %v1949_v24 = vpop.eup %1948  ;;  %v528_v18 = vadd.f32 1.0, %v520_v58 }
  0xb3   : > { %v606_v15 = vadd.f32 -0.28449672, %v598_v7  ;;  %v589_v16 = vmul.f32 %v581_v8, %v2213_v57  ;;  %v575_v30 = vadd.f32 -1.4531521, %v567_v10  ;;  %v784_v21 = vmul.f32 %v1949_v24, %v780_v54  ;;  %v1951_v45 = vpop.eup %1950 }
  0xb4   : > { %v791_v32 = vadd.f32 -1.4531521, %v789_v13  ;;  %v877_v53 = vmul.f32 %v1951_v45, %v873_v5  ;;  %v1953_v54 = vpop.eup %1952  ;;  %v810_v5 = vmul.f32 %v808_v20, %v2201_v42  ;;  %v2276_v42 = vld [vmem:[%s3155_s4] sm:$0xff]  ;;  %1960 = vrcp.f32 %v528_v18 }
  0xb5   : > { %v614_v26 = vmul.f32 %v606_v15, %v2198_v39  ;;  %v597_v31 = vadd.f32 1.4214138, %v589_v16  ;;  %v583_v34 = vmul.f32 %v575_v30, %v2219_v4  ;;  %v786_v49 = vsub.f32 2.0, %v784_v21  ;;  %v1955_v13 = vpop.eup %1954 }
  0xb6   : > { %v793_v28 = vmul.f32 %v791_v32, %v2224_v9  ;;  %v879_v62 = vsub.f32 2.0, %v877_v53  ;;  %v901_v15 = vsub.f32 0.0, %v2209_v47  ;;  %v2271_v16 = vmul.f32 0.5, %v2217_v1  ;;  %v1957_v35 = vpop.eup %1956 }
  0xb7   : > { %v622_v41 = vadd.f32 0.2548296, %v614_v26  ;;  %v605_v17 = vmul.f32 %v597_v31, %v2213_v57  ;;  %v591_v48 = vadd.f32 1.4214138, %v583_v34  ;;  %v2249_v56 = vmul.f32 %v1949_v24, %v786_v49 }
  0xb8   : > { %v795_v52 = vadd.f32 1.4214138, %v793_v28  ;;  %v2261_v7 = vmul.f32 %v1951_v45, %v879_v62  ;;  %v813_v34 = vmul.f32 1.442695, %v810_v5  ;;  %v2281_v1 = vmul.f32 0.5, %v2193_v37  ;;  %v2286_v28 = vpop.f32.mrf.mxu2 }
  0xb9   : > { %v630_v50 = vmul.f32 %v622_v41, %v2198_v39  ;;  %v613_v51 = vadd.f32 -0.28449672, %v605_v17  ;;  %v599_v55 = vmul.f32 %v591_v48, %v2219_v4  ;;  %v2257_v39 = vmul.f32 0.5, %v2180_v22  ;;  %v1959_v48 = vpop.eup %1958 }
  0xba   : > { %v797_v61 = vmul.f32 %v795_v52, %v2224_v9  ;;  %v790_v0 = vmul.f32 1.0614054, %v2249_v56  ;;  %v883_v26 = vmul.f32 1.0614054, %v2261_v7  ;;  %v2289_v45 = vperm.slane %v2276_v42, 1 }
  0xbb   : > { %v670_v59 = vmul.f32 %v1953_v54, %v630_v50  ;;  %v621_v60 = vmul.f32 %v613_v51, %v2213_v57  ;;  %v607_v63 = vadd.f32 -0.28449672, %v599_v55  ;;  %v903_v37 = vmul.f32 %v901_v15, %v2209_v47 }
  0xbc   : > { %v799_v3 = vadd.f32 -0.28449672, %v797_v61  ;;  %v792_v11 = vadd.f32 -1.4531521, %v790_v0  ;;  %v885_v44 = vadd.f32 -1.4531521, %v883_v26  ;;  %1962 = vpow2.f32 %v813_v34  ;;  %v1961_v0 = vpop.eup %1960 }
  0xbd   : > { %v678_v2 = vsub.f32 1.0, %v670_v59  ;;  %v629_v8 = vadd.f32 0.2548296, %v621_v60  ;;  %v615_v10 = vmul.f32 %v607_v63, %v2219_v4  ;;  %v2301_v51 = vperm.slane %v2276_v42, 4  ;;  %v2312_v60 = vpop.f32.mrf.mxu0 }
  0xbe   : > { %v801_v22 = vmul.f32 %v799_v3, %v2224_v9  ;;  %v794_v30 = vmul.f32 %v792_v11, %v2249_v56  ;;  %v887_v20 = vmul.f32 %v885_v44, %v2261_v7  ;;  %v2307_v53 = vmul.f32 0.5, %v2191_v36 }
  0xbf   : > { %v623_v24 = vadd.f32 0.2548296, %v615_v10  ;;  %v694_v31 = vsub.f32 0.0, %v678_v2  ;;  %v637_v21 = vmul.f32 %v629_v8, %v2213_v57  ;;  %v2294_v57 = vshrl.u32 %v940_v29, 7  ;;  %3171 = vst [vmem:[#allocation3_spill] sm:$0xff] %v2301_v51 }
  0xc0   : > { %v803_v32 = vadd.f32 0.2548296, %v801_v22  ;;  %v796_v17 = vadd.f32 1.4214138, %v794_v30  ;;  %v2310_v55 = vstv %s736_s14  ;;  %v905_v14 = vmul.f32 1.442695, %v903_v37 }
  0xc1   : > { %v631_v41 = vmul.f32 %v623_v24, %v2219_v4  ;;  %v702_v50 = vsel %vm686_vm1, %v678_v2, %v694_v31  ;;  %v677_v47 = vmul.f32 %v1959_v48, %v637_v21  ;;  %v943_v54 = vadd.s32 16, %v2294_v57 }
  0xc2   : > { %v805_v46 = vmul.f32 %v803_v32, %v2224_v9  ;;  %v798_v4 = vmul.f32 %v796_v17, %v2249_v56  ;;  %v2304_v9 = vmul.f32 0.70710677, %v2286_v28  ;;  %v710_v61 = vadd.f32 1.0, %v702_v50  ;;  %v1963_v26 = vpop.eup %1962 }
  0xc3   : > { %v671_v49 = vmul.f32 %v1955_v13, %v631_v41  ;;  %vm1109_vm4 = vcmp.lt.s32.totalorder %v2294_v57, 1  ;;  %vm1182_vm5 = vcmp.lt.s32.totalorder %v2294_v57, 7  ;;  %v942_v36 = vadd.s32 8, %v2294_v57 }
  0xc4   : > { %v815_v52 = vmul.f32 %v1957_v35, %v805_v46  ;;  %v800_v59 = vadd.f32 -0.28449672, %v798_v4  ;;  %v889_v63 = vadd.f32 1.4214138, %v887_v20  ;;  %v2320_v3 = vperm.slane %v2276_v42, 0 }
  0xc5   : > { %v679_v58 = vsub.f32 1.0, %v671_v49  ;;  %v2324_v8 = vand.u32 2147483647, %v2304_v9  ;;  %v685_v10 = vsub.f32 1.0, %v677_v47  ;;  %v971_v11 = vand.u32 15, %v943_v54  ;;  %v2363_v47 = vpop.f32.mrf.mxu0 }
  0xc6   : > { %v817_v62 = vsub.f32 1.0, %v815_v52  ;;  %v802_v5 = vmul.f32 %v800_v59, %v2249_v56  ;;  %v891_v22 = vmul.f32 %v889_v63, %v2261_v7  ;;  %v544_v15 = vmul.f32 %v1961_v0, %v528_v18 }
  0xc7   : > { %v695_v2 = vsub.f32 0.0, %v679_v58  ;;  %v2330_v24 = vperm.slane %v2276_v42, 2  ;;  %v872_v30 = vmul.f32 0.3275911, %v2324_v8  ;;  %v2335_v31 = vmul.f32 %v710_v61, %v2221_v6 }
  0xc8   : > { %v804_v29 = vadd.f32 0.2548296, %v802_v5  ;;  %v821_v32 = vsub.f32 0.0, %v817_v62  ;;  %v964_v34 = vand.u32 15, %v942_v36  ;;  %1964 = vpow2.f32 %v905_v14 }
  0xc9   : > { %v703_v13 = vsel %vm687_vm2, %v679_v58, %v695_v2  ;;  %v893_v23 = vadd.f32 -0.28449672, %v891_v22  ;;  %v552_v21 = vsub.f32 2.0, %v544_v15  ;;  %v701_v41 = vsub.f32 0.0, %v685_v10 }
  0xca   : > { %v711_v35 = vadd.f32 1.0, %v703_v13  ;;  %v806_v18 = vmul.f32 %v804_v29, %v2249_v56  ;;  %vm2339_vm8 = vcmp.gt.s32.totalorder %v971_v11, 0  ;;  %v874_v44 = vadd.f32 1.0, %v872_v30 }
  0xcb   : > { %v895_v37 = vmul.f32 %v893_v23, %v2261_v7  ;;  %v2351_v56 = vmul.f32 %v1961_v0, %v552_v21  ;;  %v1099_v48 = vrot.slane %v2335_v31, 7  ;;  %v2355_v49 = vperm.slane %v2276_v42, 3 }
  0xcc   : > { %v2344_v46 = vmul.f32 %v711_v35, %v2238_v33  ;;  %v816_v6 = vmul.f32 %v1963_v26, %v806_v18  ;;  %v640_v4 = vsub.f32 0.0, %v2242_v40  ;;  %1966 = vrcp.f32 %v874_v44 }
  0xcd   : > { %v1172_v33 = vrot.slane %v2335_v31, 1  ;;  %v823_v20 = vsel %vm819_vm3, %v817_v62, %v821_v32  ;;  %v709_v58 = vsel %vm693_vm6, %v685_v10, %v701_v41  ;;  %v3160_v14 = vmov 0.0  }
  0xce   : > { %v3158_v50 = vrot.slane %v2344_v46, 7  ;;  %v3159_v52 = vrot.slane %v2344_v46, 1  ;;  %v1965_v54 = vpop.eup %1964  ;;  %v818_v59 = vsub.f32 1.0, %v816_v6  ;;  %v2370_v61 = vsel %vm2339_vm8, 1.0, %v3160_v14 }
  0xcf   : > { %vm2372_vm9 = vcmp.lt.s32.totalorder %v964_v34, 15  ;;  %v897_v36 = vadd.f32 0.2548296, %v895_v37  ;;  %v568_v63 = vmul.f32 1.0614054, %v2351_v56  ;;  %v825_v0 = vadd.f32 1.0, %v823_v20 }
  0xd0   : > { %v2382_v62 = vsel %vm1109_vm4, %v1099_v48, %v3158_v50  ;;  %v2390_v19 = vsel %vm1182_vm5, %v1172_v33, %v3159_v52  ;;  %v1258_v5 = vmul.f32 %v2289_v45, %v2344_v46  ;;  %v822_v10 = vsub.f32 0.0, %v818_v59 }
  0xd1   : > { %v1249_v2 = vmul.f32 %v2320_v3, %v2382_v62  ;;  %v717_v11 = vadd.f32 1.0, %v709_v58  ;;  %v899_v22 = vmul.f32 %v897_v36, %v2261_v7  ;;  %v576_v15 = vadd.f32 -1.4531521, %v568_v63  ;;  %v485_v36 = vpop.f32.mrf.mxu0 }
  0xd2   : > { %v648_v13 = vmul.f32 %v640_v4, %v2242_v40  ;;  %v1967_v29 = vpop.eup %1966  ;;  %v824_v26 = vsel %vm820_vm7, %v818_v59, %v822_v10  ;;  %v2407_v32 = vsel %vm2372_vm9, 1.0, %v3160_v14  ;;  %v2410_v34 = vmul.f32 0.70710677, %v2312_v60 }
  0xd3   : > { %v2400_v30 = vadd.f32 %v1258_v5, %v1249_v2  ;;  %v826_v35 = vadd.f32 1.0, %v824_v26  ;;  %v909_v18 = vmul.f32 %v1965_v54, %v899_v22  ;;  %v2412_v7 = vstv %s739_s21 }
  0xd4   : > { %v584_v40 = vmul.f32 %v576_v15, %v2351_v56  ;;  %v827_v23 = vmul.f32 %v825_v0, %v2257_v39  ;;  %v878_v21 = vmul.f32 %v1967_v29, %v874_v44  ;;  %v902_v38 = vsub.f32 0.0, %v2324_v8 }
  0xd5   : > { %v513_v41 = vand.u32 2147483647, %v2410_v34  ;;  %v2419_v17 = vmul.f32 %v717_v11, %v2234_v27  ;;  %v658_v37 = vmul.f32 1.442695, %v648_v13  ;;  %v945_v4 = vadd.s32 32, %v2294_v57 }
  0xd6   : > { %v592_v6 = vadd.f32 1.4214138, %v584_v40  ;;  %v2424_v20 = vmul.f32 %v2289_v45, %v2335_v31  ;;  %v2428_v39 = vmul.f32 0.5, %v2286_v28  ;;  %v880_v44 = vsub.f32 2.0, %v878_v21 }
  0xd7   : > { %3176 = vst [vmem:[#allocation4_spill] sm:$0xff] %v2419_v17  ;;  %v521_v54 = vmul.f32 0.3275911, %v513_v41  ;;  %v2432_v58 = vmul.f32 %v2301_v51, %v2335_v31  ;;  %v828_v27 = vmul.f32 %v826_v35, %v2307_v53  ;;  %v911_v59 = vsub.f32 1.0, %v909_v18 }
  0xd8   : > { %v600_v25 = vmul.f32 %v592_v6, %v2351_v56  ;;  %v2437_v63 = vmul.f32 %v2310_v55, %v827_v23  ;;  %v2439_v0 = vmul.f32 %v1967_v29, %v880_v44  ;;  %v904_v28 = vmul.f32 %v902_v38, %v2324_v8 }
  0xd9   : > { %v529_v2 = vadd.f32 1.0, %v521_v54  ;;  %1968 = vpow2.f32 %v658_v37  ;;  %v985_v11 = vand.u32 15, %v945_v4  ;;  %v2446_v53 = vmul.f32 %v2301_v51, %v2419_v17 }
  0xda   : > { %v608_v22 = vadd.f32 -0.28449672, %v600_v25  ;;  %v884_v15 = vmul.f32 1.0614054, %v2439_v0  ;;  %v2451_v13 = vmul.f32 %v2301_v51, %v2344_v46  ;;  %v831_v8 = vmul.f32 %v2310_v55, %v828_v27 }
  0xdb   : > { %3177 = vst [vmem:[#allocation5_spill] sm:$0xff] %v2446_v53  ;;  %1970 = vrcp.f32 %v529_v2  ;;  %v915_v29 = vsub.f32 0.0, %v911_v59  ;;  %v2455_v26 = vmul.f32 0.5, %v2312_v60  ;;  %v3162_v35 = vrot.slane %v2437_v63, 7 }
  0xdc   : > { %v907_v40 = vmul.f32 1.442695, %v904_v28  ;;  %v2460_v23 = vmul.f32 0.70710677, %v2363_v47  ;;  %v2464_v21 = vmul.f32 %v2289_v45, %v2437_v63  ;;  %v616_v38 = vmul.f32 %v608_v22, %v2351_v56 }
  0xdd   : > { %vm1126_vm11 = vcmp.gt.s32.totalorder %v985_v11, 0  ;;  %v886_v55 = vadd.f32 -1.4531521, %v884_v15  ;;  %v2469_v60 = vmul.f32 %v2330_v24, %v2390_v19  ;;  %v2473_v6 = vmul.f32 %v2355_v49, %v2382_v62 }
  0xde   : > { %v641_v37 = vsub.f32 0.0, %v513_v41  ;;  %v2476_v4 = vmul.f32 0.5, %v2363_v47  ;;  %v1098_v54 = vrot.slane %v831_v8, 7  ;;  %v917_v27 = vsel %vm913_vm10, %v911_v59, %v915_v29  ;;  %v2492_v29 = vpop.f32.mrf.mxu0 }
  0xdf   : > { %v1969_v44 = vpop.eup %1968  ;;  %v624_v25 = vadd.f32 0.2548296, %v616_v38  ;;  %v888_v28 = vmul.f32 %v886_v55, %v2439_v0  ;;  %v2483_v22 = vsel %vm1126_vm11, 1.0, %v3160_v14  ;;  %1972 = vpow2.f32 %v907_v40 }
  0xe0   : > { %v2486_v62 = vand.u32 2147483647, %v2460_v23  ;;  %v2488_v47 = vmul.f32 0.5, %v485_v36  ;;  %v1171_v15 = vrot.slane %v831_v8, 1  ;;  %v957_v59 = vand.u32 15, %v2294_v57 }
  0xe1   : > { %v1971_v11 = vpop.eup %1970  ;;  %v632_v5 = vmul.f32 %v624_v25, %v2351_v56  ;;  %v890_v43 = vadd.f32 1.4214138, %v888_v28  ;;  %v919_v38 = vadd.f32 1.0, %v917_v27  ;;  %v649_v10 = vmul.f32 %v641_v37, %v513_v41 }
  0xe2   : > { %3178 = vst [vmem:[#allocation6_spill] sm:$0xff] %v2488_v47  ;;  %v545_v55 = vmul.f32 %v1971_v11, %v529_v2  ;;  %v522_v50 = vmul.f32 0.3275911, %v2486_v62  ;;  %v1119_v40 = vsel %vm1109_vm4, %v1098_v54, %v1099_v48  ;;  %v2500_v18 = vmul.f32 0.70710677, %v485_v36 }
  0xe3   : > { %v672_v52 = vmul.f32 %v1969_v44, %v632_v5  ;;  %v892_v14 = vmul.f32 %v890_v43, %v2439_v0  ;;  %v1120_v56 = vsel %vm1109_vm4, %v3162_v35, %v1098_v54  ;;  %v2507_v41 = vmul.f32 0.70710677, %v2492_v29 }
  0xe4   : > { %v553_v27 = vsub.f32 2.0, %v545_v55  ;;  %v530_v2 = vadd.f32 1.0, %v522_v50  ;;  %v1192_v48 = vsel %vm1182_vm5, %v1171_v15, %v1172_v33  ;;  %v515_v36 = vand.u32 2147483647, %v2500_v18 }
  0xe5   : > { %v680_v5 = vsub.f32 1.0, %v672_v52  ;;  %v894_v37 = vadd.f32 -0.28449672, %v892_v14  ;;  %v1973_v44 = vpop.eup %1972  ;;  %v3179_v25 = vrot.slane %v2437_v63, 1  ;;  %v516_v50 = vand.u32 2147483647, %v2507_v41 }
  0xe6   : > { %v2518_v28 = vmul.f32 %v1971_v11, %v553_v27  ;;  %1974 = vrcp.f32 %v530_v2  ;;  %v1247_v31 = vmul.f32 %v2320_v3, %v1120_v56  ;;  %v523_v52 = vmul.f32 0.3275911, %v515_v36 }
  0xe7   : > { %v1193_v54 = vsel %vm1182_vm5, %v3179_v25, %v1171_v15  ;;  %v696_v43 = vsub.f32 0.0, %v680_v5  ;;  %v896_v33 = vmul.f32 %v894_v37, %v2439_v0  ;;  %v1232_v14 = vmul.f32 %v2407_v32, %v1192_v48 }
  0xe8   : > { %v1256_v55 = vmul.f32 %v2289_v45, %v831_v8  ;;  %v569_v35 = vmul.f32 1.0614054, %v2518_v28  ;;  %v524_v53 = vmul.f32 0.3275911, %v516_v50  ;;  %v1160_v15 = vmul.f32 %v2370_v61, %v1119_v40 }
  0xe9   : > { %v704_v11 = vsel %vm688_vm12, %v680_v5, %v696_v43  ;;  %v898_v27 = vadd.f32 0.2548296, %v896_v33  ;;  %v531_v25 = vadd.f32 1.0, %v523_v52  ;;  %v2530_v56 = vmul.f32 %v2330_v24, %v1193_v54 }
  0xea   : > { %v921_v37 = vmul.f32 %v919_v38, %v2281_v1  ;;  %vm914_vm13 = vcmp.ge.f32.partialorder %v2304_v9, 0.0  ;;  %v577_v32 = vadd.f32 -1.4531521, %v569_v35  ;;  %v532_v48 = vadd.f32 1.0, %v524_v53 }
  0xeb   : > { %v1264_v8 = vadd.f32 %v1256_v55, %v1247_v31  ;;  %v900_v17 = vmul.f32 %v898_v27, %v2439_v0  ;;  %vm2535_vm14 = vcmp.gt.s32.totalorder %v957_v59, 0  ;;  %1976 = vrcp.f32 %v531_v25 }
  0xec   : > { %v1975_v12 = vpop.eup %1974  ;;  %v1273_v61 = vmul.f32 %v2330_v24, %v1232_v14  ;;  %v712_v40 = vadd.f32 1.0, %v704_v11  ;;  %v585_v5 = vmul.f32 %v577_v32, %v2518_v28  ;;  %1978 = vrcp.f32 %v532_v48 }
  0xed   : > { %v2542_v1 = vmul.f32 %v2320_v3, %v1160_v15  ;;  %v910_v35 = vmul.f32 %v1973_v44, %v900_v17  ;;  %v546_v53 = vmul.f32 %v1975_v12, %v530_v2  ;;  %v642_v38 = vsub.f32 0.0, %v2486_v62 }
  0xee   : > { %v2546_v0 = vmul.f32 %v2355_v49, %v1160_v15  ;;  %v593_v59 = vadd.f32 1.4214138, %v585_v5  ;;  %v660_v54 = vmul.f32 1.442695, %v649_v10  ;;  %v643_v31 = vsub.f32 0.0, %v515_v36 }
  0xef   : > { %v2549_v43 = vmul.f32 %v2412_v7, %v921_v37  ;;  %v912_v33 = vsub.f32 1.0, %v910_v35  ;;  %v554_v52 = vsub.f32 2.0, %v546_v53  ;;  %v644_v14 = vsub.f32 0.0, %v516_v50 }
  0xf0   : > { %v1281_v55 = vadd.f32 %v1273_v61, %v1264_v8  ;;  %v2552_v11 = vmul.f32 %v712_v40, %v2271_v16  ;;  %v3183_v17 = vmov 0.0   ;;  %v601_v44 = vmul.f32 %v593_v59, %v2518_v28 }
  0xf1   : > { %3182 = vst [vmem:[#allocation7_spill] sm:$0xff] %v2549_v43  ;;  %v1851_v2 = vsel %vm2535_vm14, 1.0, %v3183_v17  ;;  %v1977_v15 = vpop.eup %1976  ;;  %v916_v27 = vsub.f32 0.0, %v912_v33  ;;  %v2558_v10 = vmul.f32 %v1975_v12, %v554_v52  ;;  %v650_v37 = vmul.f32 %v642_v38, %v2486_v62 }
  0xf2   : > { %v944_v32 = vadd.s32 24, %v2294_v57  ;;  %v1979_v5 = vpop.eup %1978  ;;  %v609_v35 = vadd.f32 -0.28449672, %v601_v44  ;;  %1980 = vpow2.f32 %v660_v54  ;;  %v547_v8 = vmul.f32 %v1977_v15, %v531_v25 }
  0xf3   : > { %v651_v16 = vmul.f32 %v643_v31, %v515_v36  ;;  %v918_v61 = vsel %vm914_vm13, %v912_v33, %v916_v27  ;;  %v570_v51 = vmul.f32 1.0614054, %v2558_v10  ;;  %v548_v40 = vmul.f32 %v1979_v5, %v532_v48 }
  0xf4   : > { %v652_v53 = vmul.f32 %v644_v14, %v516_v50  ;;  %v1174_v59 = vrot.slane %v2552_v11, 1  ;;  %v920_v12 = vadd.f32 1.0, %v918_v61  ;;  %v617_v52 = vmul.f32 %v609_v35, %v2518_v28  ;;  %v1636_v61 = vld [vmem:[%s3156_s5 + $0x70] sm:$0xff] }
  0xf5   : > { %v555_v62 = vsub.f32 2.0, %v547_v8  ;;  %v578_v38 = vadd.f32 -1.4531521, %v570_v51  ;;  %v662_v43 = vmul.f32 1.442695, %v650_v37  ;;  %v556_v47 = vsub.f32 2.0, %v548_v40 }
  0xf6   : > { %v978_v44 = vand.u32 15, %v944_v32  ;;  %v922_v25 = vmul.f32 %v920_v12, %v2428_v39  ;;  %v625_v36 = vadd.f32 0.2548296, %v617_v52  ;;  %v664_v9 = vmul.f32 1.442695, %v651_v16  ;;  %v1637_v16 = vld [vmem:[%s3156_s5 + $0x78] sm:$0xff] }
  0xf7   : > { %v2568_v54 = vmul.f32 %v1977_v15, %v555_v62  ;;  %vm689_vm15 = vcmp.ge.f32.partialorder %v2410_v34, 0.0  ;;  %v586_v50 = vmul.f32 %v578_v38, %v2558_v10  ;;  %v2572_v48 = vmul.f32 %v1979_v5, %v556_v47  ;;  %1638 = vmatpush.msrb.mxu1 %v1637_v16  ;;  %1866 = vmatpush.msra.mxu2 %v1637_v16  ;;  %v1635_v38 = vld [vmem:[%s3156_s5 + $0x68] sm:$0xff] }
  0xf8   : > { %v2574_v31 = vmul.f32 1.442695, %v652_v53  ;;  %vm1198_vm1 = vcmp.lt.s32.totalorder %v978_v44, 15  ;;  %v1981_v33 = vpop.eup %1980  ;;  %v2577_v14 = vmul.f32 %v2412_v7, %v922_v25  ;;  %v633_v27 = vmul.f32 %v625_v36, %v2518_v28  ;;  %1867 = vmatpush.msra.mxu3 %v1637_v16 }
  0xf9   : > { %v571_v39 = vmul.f32 1.0614054, %v2568_v54  ;;  %v3184_v15 = vrot.slane %v2344_v46, 1  ;;  %v594_v47 = vadd.f32 1.4214138, %v586_v50  ;;  %v2588_v32 = vmul.f32 0.5, %v2492_v29  ;;  %1639 = vmatpush.msrb.mxu1 %v1636_v61  ;;  %1868 = vmatpush.msra.mxu2 %v1636_v61 }
  0xfa   : > { %v572_v5 = vmul.f32 1.0614054, %v2572_v48  ;;  %v1858_v7 = vsel %vm1198_vm1, 1.0, %v3183_v17  ;;  %v1108_v35 = vrot.slane %v2577_v14, 7  ;;  %v673_v28 = vmul.f32 %v1981_v33, %v633_v27  ;;  %1869 = vmatpush.msra.mxu3 %v1636_v61 }
  0xfb   : > { %v1190_v37 = vsel %vm1182_vm5, %v3184_v15, %v1174_v59  ;;  %1982 = vpow2.f32 %v662_v43  ;;  %v579_v8 = vadd.f32 -1.4531521, %v571_v39  ;;  %v1101_v29 = vrot.slane %v2552_v11, 7  ;;  %v1634_v39 = vld [vmem:[%s3156_s5 + $0x60] sm:$0xff]  ;;  %1640 = vmatpush.msrb.mxu1 %v1635_v38  ;;  %1870 = vmatpush.msra.mxu2 %v1635_v38 }
  0xfc   : > { %v602_v51 = vmul.f32 %v594_v47, %v2558_v10  ;;  %v580_v40 = vadd.f32 -1.4531521, %v572_v5  ;;  %v1234_v53 = vmul.f32 %v1858_v7, %v1190_v37  ;;  %v3185_v12 = vrot.slane %v2437_v63, 7  ;;  %1871 = vmatpush.msra.mxu3 %v1635_v38 }
  0xfd   : > { %v681_v52 = vsub.f32 1.0, %v673_v28  ;;  %v587_v62 = vmul.f32 %v579_v8, %v2568_v54  ;;  %v1298_v44 = vadd.f32 %v2473_v6, %v1281_v55  ;;  %1984 = vpow2.f32 %v664_v9  ;;  %1641 = vmatpush.msrb.mxu1 %v1634_v39  ;;  %1872 = vmatpush.msra.mxu2 %v1634_v39 }
  0xfe   : > { %v1121_v43 = vsel %vm1109_vm4, %v1108_v35, %v3185_v12  ;;  %v610_v36 = vadd.f32 -0.28449672, %v602_v51  ;;  %v588_v50 = vmul.f32 %v580_v40, %v2572_v48  ;;  %v1275_v15 = vmul.f32 %v2330_v24, %v1234_v53  ;;  %1873 = vmatpush.msra.mxu3 %v1634_v39 }
  0xff   : > { %v1158_v25 = vmul.f32 %v1851_v2, %v1121_v43  ;;  %v697_v33 = vsub.f32 0.0, %v681_v52  ;;  %v595_v27 = vadd.f32 1.4214138, %v587_v62  ;;  %v1315_v37 = vadd.f32 %v2451_v13, %v1298_v44  ;;  %v1632_v43 = vld [vmem:[%s3156_s5 + $0x50] sm:$0xff] }
 0x100   : > { %v3186_v6 = vrot.slane %v2344_v46, 7  ;;  %v618_v9 = vmul.f32 %v610_v36, %v2558_v10  ;;  %v596_v47 = vadd.f32 1.4214138, %v588_v50  ;;  %v1633_v46 = vld [vmem:[%s3156_s5 + $0x58] sm:$0xff]  ;;  %v2633_v28 = vperm.slane %v2276_v42, 5 }
 0x101   : > { %v1246_v2 = vmul.f32 %v2320_v3, %v1158_v25  ;;  %v1983_v5 = vpop.eup %1982  ;;  %v705_v7 = vsel %vm689_vm15, %v681_v52, %v697_v33  ;;  %v603_v13 = vmul.f32 %v595_v27, %v2568_v54  ;;  %v2636_v8 = vadd.f32 %v1275_v15, %v2400_v30  ;;  %1642 = vmatpush.msrb.mxu1 %v1633_v46 }
 0x102   : > { %v1117_v55 = vsel %vm1109_vm4, %v3186_v6, %v1101_v29  ;;  %v713_v61 = vadd.f32 1.0, %v705_v7  ;;  %v626_v51 = vadd.f32 0.2548296, %v618_v9  ;;  %v604_v34 = vmul.f32 %v596_v47, %v2572_v48  ;;  %1874 = vmatpush.msra.mxu2 %v1633_v46  ;;  %1875 = vmatpush.msra.mxu3 %v1633_v46  ;;  %v1629_v9 = vld [vmem:[%s3156_s5 + $0x38] sm:$0xff] }
 0x103   : > { %v1263_v16 = vadd.f32 %v2464_v21, %v1246_v2  ;;  %v2641_v40 = vmul.f32 %v2483_v22, %v1117_v55  ;;  %v611_v12 = vadd.f32 -0.28449672, %v603_v13  ;;  %v1324_v30 = vmul.f32 %v2633_v28, %v1234_v53  ;;  %v1985_v52 = vpop.eup %1984  ;;  %1643 = vmatpush.msrb.mxu1 %v1632_v43 }
 0x104   : > { %v1265_v21 = vadd.f32 %v2424_v20, %v2542_v1  ;;  %v634_v62 = vmul.f32 %v626_v51, %v2558_v10  ;;  %vm690_vm2 = vcmp.ge.f32.partialorder %v2460_v23, 0.0  ;;  %v612_v38 = vadd.f32 -0.28449672, %v604_v34  ;;  %v1631_v20 = vld [vmem:[%s3156_s5 + $0x48] sm:$0xff]  ;;  %1876 = vmatpush.msra.mxu2 %v1632_v43  ;;  %1877 = vmatpush.msra.mxu3 %v1632_v43  ;;  %v3194_v43 = vld [vmem:[#allocation3_spill] sm:$0xff] }
 0x105   : > { %v1280_v22 = vadd.f32 %v2530_v56, %v1263_v16  ;;  %v946_v44 = vadd.s32 40, %v2294_v57  ;;  %v2654_v25 = vmul.f32 %v713_v61, %v2455_v26  ;;  %v619_v53 = vmul.f32 %v611_v12, %v2568_v54  ;;  %1644 = vmatpush.msrb.mxu1 %v1631_v20  ;;  %v1628_v16 = vld [vmem:[%s3156_s5 + $0x30] sm:$0xff] }
 0x106   : > { %v2660_v1 = vadd.f32 %v1324_v30, %v1315_v37  ;;  %v2663_v10 = vadd.f32 %v2469_v60, %v1265_v21  ;;  %v1259_v56 = vmul.f32 %v2289_v45, %v2552_v11  ;;  %1986 = vpow2.f32 %v2574_v31  ;;  %v1630_v60 = vld [vmem:[%s3156_s5 + $0x40] sm:$0xff]  ;;  %1878 = vmatpush.msra.mxu2 %v1631_v20  ;;  %1879 = vmatpush.msra.mxu3 %v1631_v20 }
 0x107   : > { %v948_v26 = vadd.s32 56, %v2294_v57  ;;  %v1323_v36 = vmul.f32 %v2633_v28, %v2390_v19  ;;  %v674_v50 = vmul.f32 %v1983_v5, %v634_v62  ;;  %v627_v33 = vadd.f32 0.2548296, %v619_v53  ;;  %1645 = vmatpush.msrb.mxu1 %v1630_v60 }
 0x108   : > { %v620_v27 = vmul.f32 %v612_v38, %v2572_v48  ;;  %v1297_v39 = vadd.f32 %v2546_v0, %v1280_v22  ;;  %v1250_v31 = vmul.f32 %v2320_v3, %v2641_v40  ;;  %vm691_vm3 = vcmp.ge.f32.partialorder %v2500_v18, 0.0  ;;  %1880 = vmatpush.msra.mxu2 %v1630_v60  ;;  %1881 = vmatpush.msra.mxu3 %v1630_v60 }
 0x109   : > { %v2680_v19 = vperm.slane %v2276_v42, 6  ;;  %v2683_v15 = vperm.slane %v2276_v42, 7  ;;  %v992_v37 = vand.u32 15, %v946_v44  ;;  %v1102_v6 = vrot.slane %v2654_v25, 7  ;;  %1646 = vmatpush.msrb.mxu1 %v1629_v9 }
 0x10a   : > { %v682_v55 = vsub.f32 1.0, %v674_v50  ;;  %v635_v2 = vmul.f32 %v627_v33, %v2568_v54  ;;  %v628_v0 = vadd.f32 0.2548296, %v620_v27  ;;  %v1175_v47 = vrot.slane %v2654_v25, 1  ;;  %1882 = vmatpush.msra.mxu2 %v1629_v9  ;;  %1883 = vmatpush.msra.mxu3 %v1629_v9 }
 0x10b   : > { %vm692_vm6 = vcmp.ge.f32.partialorder %v2507_v41, 0.0  ;;  %v1006_v5 = vand.u32 15, %v948_v26  ;;  %v1314_v42 = vadd.f32 %v2432_v58, %v1297_v39  ;;  %v1357_v7 = vmul.f32 %v2683_v15, %v2552_v11  ;;  %1647 = vmatpush.msrb.mxu1 %v1628_v16 }
 0x10c   : > { %v698_v13 = vsub.f32 0.0, %v682_v55  ;;  %v675_v54 = vmul.f32 %v1985_v52, %v635_v2  ;;  %v636_v46 = vmul.f32 %v628_v0, %v2572_v48  ;;  %v947_v61 = vadd.s32 48, %v2294_v57  ;;  %v1987_v51 = vpop.eup %1986  ;;  %v1627_v52 = vld [vmem:[%s3156_s5 + $0x28] sm:$0xff]  ;;  %1884 = vmatpush.msra.mxu2 %v1628_v16  ;;  %1885 = vmatpush.msra.mxu3 %v1628_v16 }
 0x10d   : > { %v2700_v34 = vadd.f32 %v1259_v56, %v1250_v31  ;;  %v1331_v58 = vadd.f32 %v1323_v36, %v1314_v42  ;;  %v1340_v12 = vmul.f32 %v2680_v19, %v2641_v40  ;;  %vm2704_vm7 = vcmp.lt.s32.totalorder %v992_v37, 15  ;;  %v2739_v56 = vld [vmem:[%s3155_s4 + $0x8] ss:$0 sm:$0xff]  ;;  %1648 = vmatpush.msrb.mxu1 %v1627_v52 }
 0x10e   : > { %v706_v48 = vsel %vm690_vm2, %v682_v55, %v698_v13  ;;  %v683_v30 = vsub.f32 1.0, %v675_v54  ;;  %v676_v21 = vmul.f32 %v1987_v51, %v636_v46  ;;  %v2719_v62 = vsel %vm1109_vm4, %v1101_v29, %v1102_v6  ;;  %v1626_v29 = vld [vmem:[%s3156_s5 + $0x20] sm:$0xff]  ;;  %1886 = vmatpush.msra.mxu2 %v1627_v52  ;;  %1887 = vmatpush.msra.mxu3 %v1627_v52 }
 0x10f   : > { %v714_v38 = vadd.f32 1.0, %v706_v48  ;;  %vm2721_vm8 = vcmp.lt.s32.totalorder %v1006_v5, 15  ;;  %v2731_v23 = vsel %vm1182_vm5, %v1174_v59, %v1175_v47  ;;  %v1348_v44 = vadd.f32 %v1340_v12, %v1331_v58  ;;  %1649 = vmatpush.msrb.mxu1 %v1626_v29 }
 0x110   : > { %v699_v53 = vsub.f32 0.0, %v683_v30  ;;  %v684_v20 = vsub.f32 1.0, %v676_v21  ;;  %v999_v26 = vand.u32 15, %v947_v61  ;;  %v1291_v36 = vmul.f32 %v2355_v49, %v2641_v40  ;;  %v1625_v40 = vld [vmem:[%s3156_s5 + $0x18] sm:$0xff]  ;;  %1888 = vmatpush.msra.mxu2 %v1626_v29  ;;  %1889 = vmatpush.msra.mxu3 %v1626_v29  ;;  %v1623_v61 = vld [vmem:[%s3156_s5 + $0x8] sm:$0xff]  ;;  %v1622_v21 = vld [vmem:[%s3156_s5] sm:$0xff] }
 0x111   : > { %v2744_v59 = vmul.f32 %v714_v38, %v2476_v4  ;;  %v1365_v50 = vadd.f32 %v1357_v7, %v1348_v44  ;;  %v1859_v33 = vsel %vm2704_vm7, 1.0, %v3183_v17  ;;  %v1292_v27 = vmul.f32 %v2355_v49, %v2719_v62  ;;  %v3193_v7 = vld [vmem:[#allocation6_spill] sm:$0xff]  ;;  %1650 = vmatpush.msrb.mxu1 %v1625_v40 }
 0x112   : > { %v707_v60 = vsel %vm691_vm3, %v683_v30, %v699_v53  ;;  %v700_v39 = vsub.f32 0.0, %v684_v20  ;;  %v1374_v4 = vmul.f32 %v2739_v56, %v2731_v23  ;;  %v2759_v31 = vadd.f32 %v1291_v36, %v2663_v10  ;;  %v1624_v10 = vld [vmem:[%s3156_s5 + $0x10] sm:$0xff]  ;;  %1890 = vmatpush.msra.mxu2 %v1625_v40  ;;  %1891 = vmatpush.msra.mxu3 %v1625_v40 }
 0x113   : > { %v2763_v37 = vmul.f32 %v2289_v45, %v2654_v25  ;;  %v1176_v55 = vrot.slane %v2744_v59, 1  ;;  %v715_v18 = vadd.f32 1.0, %v707_v60  ;;  %v1860_v2 = vsel %vm2721_vm8, 1.0, %v3183_v17  ;;  %1651 = vmatpush.msrb.mxu1 %v1624_v10 }
 0x114   : > { %v708_v0 = vsel %vm692_vm6, %v684_v20, %v700_v39  ;;  %v2774_v9 = vadd.f32 %v1374_v4, %v1365_v50  ;;  %v1341_v5 = vmul.f32 %v2680_v19, %v2719_v62  ;;  %vm2778_vm9 = vcmp.gt.s32.totalorder %v999_v26, 0  ;;  %1892 = vmatpush.msra.mxu2 %v1624_v10  ;;  %1893 = vmatpush.msra.mxu3 %v1624_v10 }
 0x115   : > { %v2783_v13 = vmul.f32 %v715_v18, %v3193_v7  ;;  %v716_v54 = vadd.f32 1.0, %v708_v0  ;;  %v1188_v41 = vsel %vm1182_vm5, %v1175_v47, %v1176_v55  ;;  %v1300_v46 = vadd.f32 %v1292_v27, %v2636_v8  ;;  %1652 = vmatpush.msrb.mxu1 %v1623_v61 }
 0x116   : > { %v1103_v16 = vrot.slane %v2744_v59, 7  ;;  %v2797_v51 = vmul.f32 0.70710677, %v2774_v9  ;;  %v2799_v58 = vmul.f32 %v1859_v33, %v1188_v41  ;;  %v1349_v12 = vadd.f32 %v1341_v5, %v2660_v1  ;;  %1894 = vmatpush.msra.mxu2 %v1623_v61  ;;  %1895 = vmatpush.msra.mxu3 %v1623_v61  ;;  %v3195_v33 = vld [vmem:[#allocation7_spill] sm:$0xff] }
 0x117   : > { %v1309_v48 = vmul.f32 %v3194_v43, %v2654_v25  ;;  %v3170_v47 = vrot.slane %v2783_v13, 7  ;;  %v2806_v8 = vmul.f32 %v716_v54, %v2588_v32  ;;  %v1358_v30 = vmul.f32 %v2683_v15, %v2654_v25  ;;  %1653 = vmatpush.msrb.mxu1 %v1622_v21 }
 0x118   : > { %v1276_v1 = vmul.f32 %v2330_v24, %v2731_v23  ;;  %v1406_v52 = vand.u32 2147483647, %v2797_v51  ;;  %v1326_v38 = vmul.f32 %v2633_v28, %v2799_v58  ;;  %v1854_v32 = vsel %vm2778_vm9, 1.0, %v3183_v17  ;;  %1896 = vmatpush.msra.mxu2 %v1622_v21  ;;  %1897 = vmatpush.msra.mxu3 %v1622_v21 }
 0x119   : > { %v2825_v22 = vsel %vm1109_vm4, %v1103_v16, %v3170_v47  ;;  %v1177_v44 = vrot.slane %v2783_v13, 1  ;;  %v3169_v53 = vrot.slane %v2806_v8, 1  ;;  %v1317_v20 = vadd.f32 %v1309_v48, %v1300_v46 }
 0x11a   : > { %v1414_v29 = vmul.f32 0.3275911, %v1406_v52  ;;  %v1366_v26 = vadd.f32 %v1358_v30, %v1349_v12  ;;  %v1375_v36 = vmul.f32 %v2739_v56, %v2799_v58  ;;  %v1115_v50 = vsel %vm1109_vm4, %v1102_v6, %v1103_v16 }
 0x11b   : > { %v1107_v27 = vrot.slane %v3195_v33, 7  ;;  %v1186_v60 = vsel %vm1182_vm5, %v1177_v44, %v3169_v53  ;;  %v1334_v39 = vadd.f32 %v1326_v38, %v1317_v20  ;;  %v1343_v40 = vmul.f32 %v2680_v19, %v2825_v22 }
 0x11c   : > { %v2842_v4 = vmul.f32 %v1860_v2, %v1186_v60  ;;  %v1422_v18 = vadd.f32 1.0, %v1414_v29  ;;  %v1251_v25 = vmul.f32 %v2320_v3, %v2719_v62  ;;  %v1308_v6 = vmul.f32 %v3194_v43, %v2552_v11  ;;  %v3196_v60 = vld [vmem:[#allocation4_spill] sm:$0xff] }
 0x11d   : > { %v2848_v0 = vadd.f32 %v1375_v36, %v1366_v26  ;;  %v1351_v10 = vadd.f32 %v1343_v40, %v1334_v39  ;;  %v1360_v5 = vmul.f32 %v2683_v15, %v2783_v13  ;;  %v2852_v42 = vmul.f32 %v1854_v32, %v1115_v50 }
 0x11e   : > { %1988 = vrcp.f32 %v1422_v18  ;;  %v1377_v2 = vmul.f32 %v2739_v56, %v2842_v4  ;;  %v1316_v7 = vadd.f32 %v1308_v6, %v2759_v31  ;;  %v950_v62 = vadd.s32 72, %v2294_v57 }
 0x11f   : > { %v3168_v54 = vrot.slane %v3195_v33, 1  ;;  %v1534_v41 = vsub.f32 0.0, %v1406_v52  ;;  %v2860_v11 = vmul.f32 0.70710677, %v2848_v0  ;;  %v1368_v46 = vadd.f32 %v1360_v5, %v1351_v10 }
 0x120   : > { %v2864_v61 = vadd.f32 %v1276_v1, %v2700_v34  ;;  %v1268_v12 = vadd.f32 %v2763_v37, %v1251_v25  ;;  %v1325_v48 = vmul.f32 %v2633_v28, %v2731_v23  ;;  %v1187_v21 = vsel %vm1182_vm5, %v1176_v55, %v1177_v44 }
 0x121   : > { %v1407_v31 = vand.u32 2147483647, %v2860_v11  ;;  %v2870_v30 = vadd.f32 %v1377_v2, %v1368_v46  ;;  %v1342_v38 = vmul.f32 %v2680_v19, %v2852_v42  ;;  %v1261_v34 = vmul.f32 %v2289_v45, %v2744_v59 }
 0x122   : > { %v2881_v37 = vmul.f32 0.5, %v2774_v9  ;;  %v1333_v1 = vadd.f32 %v1325_v48, %v1316_v7  ;;  %v1020_v23 = vand.u32 15, %v950_v62  ;;  %v1542_v32 = vmul.f32 %v1534_v41, %v1406_v52 }
 0x123   : > { %v1415_v20 = vmul.f32 0.3275911, %v1407_v31  ;;  %v2884_v29 = vmul.f32 0.70710677, %v2870_v30  ;;  %v1359_v26 = vmul.f32 %v2683_v15, %v2744_v59  ;;  %v1535_v44 = vsub.f32 0.0, %v1407_v31 }
 0x124   : > { %v1989_v55 = vpop.eup %1988  ;;  %v1350_v36 = vadd.f32 %v1342_v38, %v1333_v1  ;;  %v1376_v50 = vmul.f32 %v2739_v56, %v1187_v21  ;;  %v3197_v9 = vrot.slane %v3196_v60, 1  ;;  %v2897_v52 = vmul.f32 %v2289_v45, %v2783_v13 }
 0x125   : > { %v1438_v40 = vmul.f32 %v1989_v55, %v1422_v18  ;;  %v1423_v25 = vadd.f32 1.0, %v1415_v20  ;;  %v1409_v6 = vand.u32 2147483647, %v2884_v29  ;;  %v1105_v10 = vrot.slane %v2806_v8, 7 }
 0x126   : > { %v1184_v39 = vsel %vm1182_vm5, %v3197_v9, %v3168_v54  ;;  %v1277_v5 = vmul.f32 %v2330_v24, %v2799_v58  ;;  %v1252_v2 = vmul.f32 %v2320_v3, %v2852_v42  ;;  %v1367_v7 = vadd.f32 %v1359_v26, %v1350_v36 }
 0x127   : > { %v1446_v62 = vsub.f32 2.0, %v1438_v40  ;;  %1990 = vrcp.f32 %v1423_v25  ;;  %v1417_v41 = vmul.f32 0.3275911, %v1409_v6  ;;  %vm1204_vm10 = vcmp.lt.s32.totalorder %v1020_v23, 15 }
 0x128   : > { %v1550_v46 = vmul.f32 1.442695, %v1542_v32  ;;  %v1543_v45 = vmul.f32 %v1535_v44, %v1407_v31  ;;  %v1278_v18 = vmul.f32 %v2330_v24, %v1187_v21  ;;  %v2906_v48 = vadd.f32 %v1376_v50, %v1367_v7 }
 0x129   : > { %v2908_v38 = vmul.f32 %v1989_v55, %v1446_v62  ;;  %v1425_v1 = vadd.f32 1.0, %v1417_v41  ;;  %v1537_v20 = vsub.f32 0.0, %v1409_v6  ;;  %v1294_v58 = vmul.f32 %v2355_v49, %v2825_v22 }
 0x12a   : > { %v2914_v26 = vmul.f32 %v2320_v3, %v2825_v22  ;;  %v2918_v23 = vmul.f32 %v3194_v43, %v2806_v8  ;;  %v1269_v31 = vadd.f32 %v1261_v34, %v1252_v2  ;;  %v2921_v32 = vmul.f32 0.70710677, %v2906_v48 }
 0x12b   : > { %v1462_v55 = vmul.f32 1.0614054, %v2908_v38  ;;  %1992 = vrcp.f32 %v1425_v1  ;;  %v1861_v44 = vsel %vm1204_vm10, 1.0, %v3183_v17  ;;  %v1285_v36 = vadd.f32 %v1277_v5, %v1268_v12 }
 0x12c   : > { %1994 = vpow2.f32 %v1550_v46  ;;  %v1552_v50 = vmul.f32 1.442695, %v1543_v45  ;;  %v2926_v9 = vmul.f32 %v2633_v28, %v1187_v21  ;;  %v1408_v3 = vand.u32 2147483647, %v2921_v32 }
 0x12d   : > { %v1991_v22 = vpop.eup %1990  ;;  %v1470_v40 = vadd.f32 -1.4531521, %v1462_v55  ;;  %v1545_v7 = vmul.f32 %v1537_v20, %v1409_v6  ;;  %v2929_v34 = vadd.f32 %v1278_v18, %v1269_v31  ;;  %v1302_v2 = vadd.f32 %v1294_v58, %v1285_v36 }
 0x12e   : > { %v1439_v62 = vmul.f32 %v1991_v22, %v1423_v25  ;;  %v1416_v41 = vmul.f32 0.3275911, %v1408_v3  ;;  %v3198_v54 = vrot.slane %v3196_v60, 7  ;;  %v2939_v21 = vmul.f32 %v1861_v44, %v1184_v39 }
 0x12f   : > { %v1478_v5 = vmul.f32 %v1470_v40, %v2908_v38  ;;  %v1311_v6 = vmul.f32 %v3194_v43, %v2783_v13  ;;  %v1328_v46 = vmul.f32 %v2633_v28, %v2842_v4  ;;  %v1293_v25 = vmul.f32 %v2355_v49, %v2852_v42 }
 0x130   : > { %v2937_v12 = vsel %vm1109_vm4, %v1105_v10, %v3198_v54  ;;  %v1447_v45 = vsub.f32 2.0, %v1439_v62  ;;  %1996 = vpow2.f32 %v1552_v50  ;;  %v1424_v18 = vadd.f32 1.0, %v1416_v41 }
 0x131   : > { %v951_v20 = vadd.s32 80, %v2294_v57  ;;  %v1993_v54 = vpop.eup %1992  ;;  %v1486_v58 = vadd.f32 1.4214138, %v1478_v5  ;;  %v1556_v39 = vmul.f32 1.442695, %v1545_v7  ;;  %v1319_v31 = vadd.f32 %v1311_v6, %v1302_v2 }
 0x132   : > { %v3199_v55 = vrot.slane %v3196_v60, 7  ;;  %v1995_v36 = vpop.eup %1994  ;;  %v2957_v40 = vmul.f32 %v1991_v22, %v1447_v45  ;;  %v1441_v42 = vmul.f32 %v1993_v54, %v1425_v1  ;;  %1998 = vrcp.f32 %v1424_v18 }
 0x133   : > { %v1345_v50 = vmul.f32 %v2680_v19, %v2937_v12  ;;  %v1494_v62 = vmul.f32 %v1486_v58, %v2908_v38  ;;  %v1336_v7 = vadd.f32 %v1328_v46, %v1319_v31  ;;  %v1301_v2 = vadd.f32 %v1293_v25, %v2864_v61 }
 0x134   : > { %v2955_v44 = vsel %vm1109_vm4, %v3199_v55, %v1107_v27  ;;  %v1027_v41 = vand.u32 15, %v951_v20  ;;  %v1463_v5 = vmul.f32 1.0614054, %v2957_v40  ;;  %v1449_v6 = vsub.f32 2.0, %v1441_v42 }
 0x135   : > { %v1362_v55 = vmul.f32 %v2683_v15, %v3196_v60  ;;  %v949_v22 = vadd.s32 64, %v2294_v57  ;;  %v1502_v45 = vadd.f32 -0.28449672, %v1494_v62  ;;  %2000 = vpow2.f32 %v1556_v39 }
 0x136   : > { %v1379_v1 = vmul.f32 %v2739_v56, %v2939_v21  ;;  %v1310_v58 = vmul.f32 %v3194_v43, %v2744_v59  ;;  %v2971_v46 = vpop.eup %1996  ;;  %v1471_v61 = vadd.f32 -1.4531521, %v1463_v5  ;;  %v2973_v25 = vmul.f32 %v1993_v54, %v1449_v6 }
 0x137   : > { %v1536_v20 = vsub.f32 0.0, %v1408_v3  ;;  %v1013_v31 = vand.u32 15, %v949_v22  ;;  %v1510_v42 = vmul.f32 %v1502_v45, %v2908_v38  ;;  %v1353_v16 = vadd.f32 %v1345_v50, %v1336_v7 }
 0x138   : > { %v1318_v53 = vadd.f32 %v1310_v58, %v1301_v2  ;;  %vm2976_vm11 = vcmp.gt.s32.totalorder %v1027_v41, 0  ;;  %v1999_v39 = vpop.eup %1998  ;;  %v1479_v47 = vmul.f32 %v1471_v61, %v2957_v40  ;;  %v1465_v59 = vmul.f32 1.0614054, %v2973_v25 }
 0x139   : > { %vm1130_vm12 = vcmp.gt.s32.totalorder %v1013_v31, 0  ;;  %v2988_v43 = vsel %vm1109_vm4, %v1107_v27, %v1108_v35  ;;  %v1518_v54 = vadd.f32 0.2548296, %v1510_v42  ;;  %v1440_v50 = vmul.f32 %v1999_v39, %v1424_v18 }
 0x13a   : > { %v3202_v7 = vrot.slane %v2783_v13, 7  ;;  %v1855_v41 = vsel %vm1130_vm12, 1.0, %v3183_v17  ;;  %vm1582_vm13 = vcmp.ge.f32.partialorder %v2797_v51, 0.0  ;;  %v1487_v5 = vadd.f32 1.4214138, %v1479_v47 }
 0x13b   : > { %v1473_v6 = vadd.f32 -1.4531521, %v1465_v59  ;;  %v1544_v22 = vmul.f32 %v1536_v20, %v1408_v3  ;;  %v2998_v58 = vpop.eup %2000  ;;  %v1526_v35 = vmul.f32 %v1518_v54, %v2908_v38  ;;  %v1448_v27 = vsub.f32 2.0, %v1440_v50 }
 0x13c   : > { %v1113_v2 = vsel %vm1109_vm4, %v3202_v7, %v1105_v10  ;;  %v1335_v18 = vadd.f32 %v2926_v9, %v1318_v53  ;;  %v1856_v13 = vsel %vm2976_vm11, 1.0, %v3183_v17  ;;  %v1495_v10 = vmul.f32 %v1487_v5, %v2957_v40 }
 0x13d   : > { %v1166_v45 = vmul.f32 %v1855_v41, %v1113_v2  ;;  %v1481_v61 = vmul.f32 %v1473_v6, %v2973_v25  ;;  %v1370_v31 = vadd.f32 %v1362_v55, %v1353_v16  ;;  %v1566_v3 = vmul.f32 %v1995_v36, %v1526_v35 }
 0x13e   : > { %v3008_v20 = vmul.f32 %v1999_v39, %v1448_v27  ;;  %v3203_v42 = vrot.slane %v3196_v60, 1  ;;  %v3204_v38 = vrot.slane %v2806_v8, 1  ;;  %v1503_v62 = vadd.f32 -0.28449672, %v1495_v10 }
 0x13f   : > { %v1295_v47 = vmul.f32 %v2355_v49, %v1166_v45  ;;  %v1344_v9 = vmul.f32 %v2680_v19, %v1166_v45  ;;  %v1489_v59 = vadd.f32 1.4214138, %v1481_v61  ;;  %v3017_v54 = vadd.f32 %v1379_v1, %v1370_v31 }
 0x140   : > { %v1185_v53 = vsel %vm1182_vm5, %v3204_v38, %v3203_v42  ;;  %v1574_v55 = vsub.f32 1.0, %v1566_v3  ;;  %v1464_v36 = vmul.f32 1.0614054, %v3008_v20  ;;  %v1361_v60 = vmul.f32 %v2683_v15, %v2806_v8 }
 0x141   : > { %v1303_v16 = vadd.f32 %v1295_v47, %v2929_v34  ;;  %v1352_v39 = vadd.f32 %v1344_v9, %v1335_v18  ;;  %v1511_v50 = vmul.f32 %v1503_v62, %v2957_v40  ;;  %v1497_v7 = vmul.f32 %v1489_v59, %v2973_v25 }
 0x142   : > { %v3026_v2 = vmul.f32 0.70710677, %v3017_v54  ;;  %v1378_v41 = vmul.f32 %v2739_v56, %v1185_v53  ;;  %v1590_v1 = vsub.f32 0.0, %v1574_v55  ;;  %v1472_v5 = vadd.f32 -1.4531521, %v1464_v36 }
 0x143   : > { %v1369_v6 = vadd.f32 %v1361_v60, %v1352_v39  ;;  %v1320_v34 = vadd.f32 %v2918_v23, %v1303_v16  ;;  %v1519_v45 = vadd.f32 0.2548296, %v1511_v50  ;;  %v1505_v35 = vadd.f32 -0.28449672, %v1497_v7 }
 0x144   : > { %v3031_v27 = vand.u32 2147483647, %v3026_v2  ;;  %v1168_v8 = vmul.f32 %v1856_v13, %v2955_v44  ;;  %v1598_v18 = vsel %vm1582_vm13, %v1574_v55, %v1590_v1  ;;  %v1480_v10 = vmul.f32 %v1472_v5, %v3008_v20 }
 0x145   : > { %v1329_v61 = vmul.f32 %v2633_v28, %v1185_v53  ;;  %v3038_v31 = vadd.f32 %v1378_v41, %v1369_v6  ;;  %v1606_v47 = vadd.f32 1.0, %v1598_v18  ;;  %v1527_v3 = vmul.f32 %v1519_v45, %v2957_v40 }
 0x146   : > { %v1513_v23 = vmul.f32 %v1505_v35, %v2973_v25  ;;  %v1419_v42 = vmul.f32 0.3275911, %v3031_v27  ;;  %v1488_v38 = vadd.f32 1.4214138, %v1480_v10  ;;  %v1554_v9 = vmul.f32 1.442695, %v1544_v22 }
 0x147   : > { %v3044_v44 = vmul.f32 0.70710677, %v3038_v31  ;;  %v1337_v51 = vadd.f32 %v1329_v61, %v1320_v34  ;;  %v1614_v13 = vmul.f32 %v1606_v47, %v2881_v37  ;;  %v1567_v62 = vmul.f32 %v2971_v46, %v1527_v3 }
 0x148   : > { %v1521_v53 = vadd.f32 0.2548296, %v1513_v23  ;;  %v1427_v59 = vadd.f32 1.0, %v1419_v42  ;;  %v1496_v16 = vmul.f32 %v1488_v38, %v3008_v20  ;;  %v3205_v55 = vrot.slane %v2577_v14, 1 }
 0x149   : > { %v3050_v40 = vand.u32 2147483647, %v3044_v44  ;;  %v3206_v36 = vrot.slane %v3195_v33, 1  ;;  %v1346_v39 = vmul.f32 %v2680_v19, %v1168_v8  ;;  %1654 = vmatmul.f32.vlgmr.msrb.gmra.mxu1 %v1614_v13  ;;  %v1575_v37 = vsub.f32 1.0, %v1567_v62 }
 0x14a   : > { %v1529_v46 = vmul.f32 %v1521_v53, %v2973_v25  ;;  %2002 = vrcp.f32 %v1427_v59  ;;  %v952_v60 = vadd.s32 88, %v2294_v57  ;;  %v1504_v50 = vadd.f32 -0.28449672, %v1496_v16 }
 0x14b   : > { %v1183_v22 = vsel %vm1182_vm5, %v3206_v36, %v3205_v55  ;;  %v1418_v7 = vmul.f32 0.3275911, %v3050_v40  ;;  %v1354_v41 = vadd.f32 %v1346_v39, %v1337_v51  ;;  %v1363_v1 = vmul.f32 %v2683_v15, %v3195_v33 }
 0x14c   : > { %vm1583_vm4 = vcmp.ge.f32.partialorder %v2860_v11, 0.0  ;;  %v1591_v5 = vsub.f32 0.0, %v1575_v37  ;;  %v1569_v6 = vmul.f32 %v2998_v58, %v1529_v46  ;;  %2004 = vpow2.f32 %v1554_v9 }
 0x14d   : > { %v1512_v34 = vmul.f32 %v1504_v50, %v3008_v20  ;;  %v1426_v45 = vadd.f32 1.0, %v1418_v7  ;;  %v1371_v25 = vadd.f32 %v1363_v1, %v1354_v41  ;;  %v1380_v35 = vmul.f32 %v2739_v56, %v1183_v22 }
 0x14e   : > { %v1391_v8 = vmul.f32 0.5, %v2848_v0  ;;  %v1599_v18 = vsel %vm1583_vm4, %v1575_v37, %v1591_v5  ;;  %v1577_v10 = vsub.f32 1.0, %v1569_v6  ;;  %v1034_v61 = vand.u32 15, %v952_v60  ;;  %v3209_v60 = vld [vmem:[#allocation5_spill] sm:$0xff] }
 0x14f   : > { %v1607_v47 = vadd.f32 1.0, %v1599_v18  ;;  %v1520_v3 = vadd.f32 0.2548296, %v1512_v34  ;;  %2006 = vrcp.f32 %v1426_v45  ;;  %v3069_v33 = vadd.f32 %v1380_v35, %v1371_v25 }
 0x150   : > { %v2003_v11 = vpop.eup %2002  ;;  %v1270_v58 = vadd.f32 %v2897_v52, %v2914_v26  ;;  %v1393_v23 = vmul.f32 0.5, %v2870_v30  ;;  %v1593_v42 = vsub.f32 0.0, %v1577_v10  ;;  %v1279_v38 = vmul.f32 %v2330_v24, %v2842_v4 }
 0x151   : > { %v1615_v9 = vmul.f32 %v1607_v47, %v1391_v8  ;;  %vm1585_vm14 = vcmp.ge.f32.partialorder %v2884_v29, 0.0  ;;  %v1528_v0 = vmul.f32 %v1520_v3, %v3008_v20  ;;  %v1443_v51 = vmul.f32 %v2003_v11, %v1427_v59 }
 0x152   : > { %v2005_v13 = vpop.eup %2004  ;;  %v1601_v62 = vsel %vm1585_vm14, %v1577_v10, %v1593_v42  ;;  %v1296_v53 = vmul.f32 %v2355_v49, %v2937_v12  ;;  %v3081_v16 = vmul.f32 0.70710677, %v3069_v33  ;;  %v1287_v52 = vadd.f32 %v1279_v38, %v1270_v58 }
 0x153   : > { %1657 = vmatmul.f32.gmra.mxu1 %v1615_v9  ;;  %v1609_v30 = vadd.f32 1.0, %v1601_v62  ;;  %v1568_v26 = vmul.f32 %v2005_v13, %v1528_v0  ;;  %v1451_v55 = vsub.f32 2.0, %v1443_v51  ;;  %vm1206_vm15 = vcmp.lt.s32.totalorder %v1034_v61, 15 }
 0x154   : > { %v1330_v24 = vmul.f32 %v2633_v28, %v2939_v21  ;;  %v3086_v4 = vand.u32 2147483647, %v3081_v16  ;;  %v3207_v29 = vrot.slane %v2437_v63, 1  ;;  %v3208_v20 = vrot.slane %v2577_v14, 1 }
 0x155   : > { %v1304_v12 = vadd.f32 %v1296_v53, %v1287_v52  ;;  %v2007_v59 = vpop.eup %2006  ;;  %v1617_v36 = vmul.f32 %v1609_v30, %v1393_v23  ;;  %v1576_v22 = vsub.f32 1.0, %v1568_v26  ;;  %v1459_v39 = vmul.f32 %v2003_v11, %v1451_v55 }
 0x156   : > { %v1194_v49 = vsel %vm1182_vm5, %v3208_v20, %v3207_v29  ;;  %v1539_v37 = vsub.f32 0.0, %v3031_v27  ;;  %v1442_v46 = vmul.f32 %v2007_v59, %v1426_v45  ;;  %v1420_v28 = vmul.f32 0.3275911, %v3086_v4 }
 0x157   : > { %v1862_v21 = vsel %vm1206_vm15, 1.0, %v3183_v17  ;;  %v1321_v50 = vadd.f32 %v3209_v60, %v1304_v12  ;;  %1663 = vmatmul.f32.vlgmr.msra.gmra.mxu2 %v1617_v36  ;;  %v1392_v63 = vmul.f32 0.5, %v2906_v48  ;;  %v1592_v7 = vsub.f32 0.0, %v1576_v22 }
 0x158   : > { %v1467_v57 = vmul.f32 1.0614054, %v1459_v39  ;;  %vm1584_vm5 = vcmp.ge.f32.partialorder %v2921_v32, 0.0  ;;  %v1450_v41 = vsub.f32 2.0, %v1442_v46  ;;  %v1428_v1 = vadd.f32 1.0, %v1420_v28 }
 0x159   : > { %v1338_v5 = vadd.f32 %v1330_v24, %v1321_v50  ;;  %v1600_v6 = vsel %vm1584_vm5, %v1576_v22, %v1592_v7  ;;  %v1242_v25 = vmul.f32 %v1862_v21, %v1194_v49  ;;  %v1347_v45 = vmul.f32 %v2680_v19, %v2988_v43 }
 0x15a   : > { %v1475_v34 = vadd.f32 -1.4531521, %v1467_v57  ;;  %v1608_v35 = vadd.f32 1.0, %v1600_v6  ;;  %v1547_v17 = vmul.f32 %v1539_v37, %v3031_v27  ;;  %v1458_v8 = vmul.f32 %v2007_v59, %v1450_v41 }
 0x15b   : > { %2008 = vrcp.f32 %v1428_v1  ;;  %v1538_v48 = vsub.f32 0.0, %v3050_v40  ;;  %v1355_v10 = vadd.f32 %v1347_v45, %v1338_v5  ;;  %v1364_v32 = vmul.f32 %v2683_v15, %v2577_v14 }
 0x15c   : > { %v1483_v18 = vmul.f32 %v1475_v34, %v1459_v39  ;;  %v1616_v61 = vmul.f32 %v1608_v35, %v1392_v63  ;;  %v1466_v47 = vmul.f32 1.0614054, %v1458_v8  ;;  %v1381_v58 = vmul.f32 %v2739_v56, %v1242_v25 }
 0x15d   : > { %v1372_v11 = vadd.f32 %v1364_v32, %v1355_v10  ;;  %v1560_v19 = vmul.f32 1.442695, %v1547_v17  ;;  %v1546_v27 = vmul.f32 %v1538_v48, %v3050_v40  ;;  %v1540_v24 = vsub.f32 0.0, %v3086_v4 }
 0x15e   : > { %v1491_v3 = vadd.f32 1.4214138, %v1483_v18  ;;  %1660 = vmatmul.f32.gmra.mxu1 %v1616_v61  ;;  %v1474_v43 = vadd.f32 -1.4531521, %v1466_v47  ;;  %vm1587_vm1 = vcmp.ge.f32.partialorder %v3026_v2, 0.0  ;;  %v1395_v6 = vmul.f32 0.5, %v3017_v54 }
 0x15f   : > { %v3108_v42 = vadd.f32 %v1381_v58, %v1372_v11  ;;  %2010 = vpow2.f32 %v1560_v19  ;;  %v1558_v62 = vmul.f32 1.442695, %v1546_v27  ;;  %v1548_v46 = vmul.f32 %v1540_v24, %v3086_v4 }
 0x160   : > { %v1499_v23 = vmul.f32 %v1491_v3, %v1459_v39  ;;  %v1482_v9 = vmul.f32 %v1474_v43, %v1458_v8  ;;  %vm1586_vm2 = vcmp.ge.f32.partialorder %v3044_v44, 0.0  ;;  %v1394_v10 = vmul.f32 0.5, %v3038_v31 }
 0x161   : > { %v2009_v38 = vpop.eup %2008  ;;  %v3111_v14 = vmul.f32 0.70710677, %v3108_v42  ;;  %2012 = vpow2.f32 %v1558_v62  ;;  %v1562_v57 = vmul.f32 1.442695, %v1548_v46  ;;  %vm1588_vm3 = vcmp.ge.f32.partialorder %v3081_v16, 0.0 }
 0x162   : > { %v1507_v0 = vadd.f32 -0.28449672, %v1499_v23  ;;  %v1444_v51 = vmul.f32 %v2009_v38, %v1428_v1  ;;  %v1490_v15 = vadd.f32 1.4214138, %v1482_v9 }
 0x163   : > { %v1413_v53 = vand.u32 2147483647, %v3111_v14  ;;  %vm1589_vm6 = vcmp.ge.f32.partialorder %v3111_v14, 0.0 }
 0x164   : > { %v1515_v13 = vmul.f32 %v1507_v0, %v1459_v39  ;;  %v1452_v56 = vsub.f32 2.0, %v1444_v51  ;;  %v1498_v52 = vmul.f32 %v1490_v15, %v1458_v8  ;;  %v1396_v15 = vmul.f32 0.5, %v3069_v33 }
 0x165   : > { %v1421_v40 = vmul.f32 0.3275911, %v1413_v53  ;;  %v2011_v12 = vpop.eup %2010  ;;  %v1541_v47 = vsub.f32 0.0, %v1413_v53 }
 0x166   : > { %v1523_v30 = vadd.f32 0.2548296, %v1515_v13  ;;  %v1460_v26 = vmul.f32 %v2009_v38, %v1452_v56  ;;  %v1506_v55 = vadd.f32 -0.28449672, %v1498_v52 }
 0x167   : > { %v1429_v49 = vadd.f32 1.0, %v1421_v40  ;;  %v2013_v50 = vpop.eup %2012  ;;  %v1549_v23 = vmul.f32 %v1541_v47, %v1413_v53 }
 0x168   : > { %v1531_v29 = vmul.f32 %v1523_v30, %v1459_v39  ;;  %v1468_v20 = vmul.f32 1.0614054, %v1460_v26  ;;  %v1514_v59 = vmul.f32 %v1506_v55, %v1458_v8 }
 0x169   : > { %2014 = vrcp.f32 %v1429_v49  ;;  %v1564_v0 = vmul.f32 1.442695, %v1549_v23 }
 0x16a   : > { %v1571_v36 = vmul.f32 %v2011_v12, %v1531_v29  ;;  %v1476_v22 = vadd.f32 -1.4531521, %v1468_v20  ;;  %v1522_v37 = vadd.f32 0.2548296, %v1514_v59  ;;  %2016 = vpow2.f32 %v1562_v57 }
 0x16b   : > { %2018 = vpow2.f32 %v1564_v0  ;;  %v1397_v29 = vmul.f32 0.5, %v3108_v42 }
 0x16c   : > { %v1579_v28 = vsub.f32 1.0, %v1571_v36  ;;  %v1484_v21 = vmul.f32 %v1476_v22, %v1460_v26  ;;  %v1530_v60 = vmul.f32 %v1522_v37, %v1458_v8 }
 0x16e   : > { %v1595_v63 = vsub.f32 0.0, %v1579_v28  ;;  %v1492_v7 = vadd.f32 1.4214138, %v1484_v21  ;;  %v1570_v39 = vmul.f32 %v2013_v50, %v1530_v60 }
 0x16f   : > { %v2015_v41 = vpop.eup %2014 }
 0x170   : > { %v1603_v1 = vsel %vm1587_vm1, %v1579_v28, %v1595_v63  ;;  %v1500_v5 = vmul.f32 %v1492_v7, %v1460_v26  ;;  %v1578_v25 = vsub.f32 1.0, %v1570_v39  ;;  %v1445_v45 = vmul.f32 %v2015_v41, %v1429_v49  ;;  %v2017_v58 = vpop.eup %2016 }
 0x171   : > { %v1611_v34 = vadd.f32 1.0, %v1603_v1 }
 0x172   : > { %v1508_v35 = vadd.f32 -0.28449672, %v1500_v5  ;;  %v1594_v17 = vsub.f32 0.0, %v1578_v25  ;;  %v1453_v8 = vsub.f32 2.0, %v1445_v45 }
 0x173   : > { %v1619_v4 = vmul.f32 %v1611_v34, %v1395_v6 }
 0x174   : > { %v1516_v18 = vmul.f32 %v1508_v35, %v1460_v26  ;;  %v1602_v2 = vsel %vm1586_vm2, %v1578_v25, %v1594_v17  ;;  %v1461_v48 = vmul.f32 %v2015_v41, %v1453_v8 }
 0x175   : > { %1669 = vmatmul.f32.vlgmr.msra.gmra.mxu3 %v1619_v4  ;;  %v1610_v32 = vadd.f32 1.0, %v1602_v2 }
 0x176   : > { %v1524_v61 = vadd.f32 0.2548296, %v1516_v18  ;;  %v1469_v54 = vmul.f32 1.0614054, %v1461_v48 }
 0x177   : > { %v1618_v3 = vmul.f32 %v1610_v32, %v1394_v10 }
 0x178   : > { %v1532_v11 = vmul.f32 %v1524_v61, %v1460_v26  ;;  %v1477_v19 = vadd.f32 -1.4531521, %v1469_v54  ;;  %v2019_v26 = vpop.eup %2018 }
 0x179   : > { %1666 = vmatmul.f32.gmra.mxu2 %v1618_v3 }
 0x17a   : > { %v1572_v43 = vmul.f32 %v2017_v58, %v1532_v11  ;;  %v1485_v27 = vmul.f32 %v1477_v19, %v1461_v48 }
 0x17c   : > { %v1580_v38 = vsub.f32 1.0, %v1572_v43  ;;  %v1493_v44 = vadd.f32 1.4214138, %v1485_v27 }
 0x17e   : > { %v1596_v9 = vsub.f32 0.0, %v1580_v38  ;;  %v1501_v51 = vmul.f32 %v1493_v44, %v1461_v48 }
 0x180   : > { %v1604_v31 = vsel %vm1588_vm3, %v1580_v38, %v1596_v9  ;;  %v1509_v62 = vadd.f32 -0.28449672, %v1501_v51 }
 0x181   : > { %v1612_v13 = vadd.f32 1.0, %v1604_v31 }
 0x182   : > { %v1517_v52 = vmul.f32 %v1509_v62, %v1461_v48 }
 0x183   : > { %v1620_v56 = vmul.f32 %v1612_v13, %v1396_v15 }
 0x184   : > { %v1525_v30 = vadd.f32 0.2548296, %v1517_v52 }
 0x185   : > { %1672 = vmatmul.f32.gmra.mxu3 %v1620_v56 }
 0x186   : > { %v1533_v53 = vmul.f32 %v1525_v30, %v1461_v48 }
 0x188   : > { %v1573_v40 = vmul.f32 %v2019_v26, %v1533_v53 }
 0x18a   : > { %v1581_v55 = vsub.f32 1.0, %v1573_v40 }
 0x18c   : > { %v1597_v24 = vsub.f32 0.0, %v1581_v55 }
 0x18e   : > { %v1605_v16 = vsel %vm1589_vm6, %v1581_v55, %v1597_v24 }
 0x18f   : > { %v1613_v20 = vadd.f32 1.0, %v1605_v16 }
 0x191   : > { %v1621_v33 = vmul.f32 %v1613_v20, %v1397_v29 }
 0x193   : > { %1675 = vmatmul.f32.gmra.mxu3 %v1621_v33 }
 0x1c6   : > { %v1655_v49 = vpop.f32.mrf.mxu1 }
 0x1c7   : > { %1679 = vst.msk [vmem:[%s417_s16] sm:$0xff] %vm428_vm0, %v1655_v49 }
 0x1d0   : > { %v1658_v12 = vpop.f32.mrf.mxu1 }
 0x1d1   : > { %1680 = vst.msk [vmem:[%s417_s16 + $0x8] sm:$0xff] %vm428_vm0, %v1658_v12 }
 0x1da   : > { %v1664_v59 = vpop.f32.mrf.mxu2 }
 0x1db   : > { %v1661_v36 = vpop.f32.mrf.mxu1  ;;  %1682 = vst.msk [vmem:[%s417_s16 + $0x18] sm:$0xff] %vm428_vm0, %v1664_v59 }
 0x1dc   : > { %1681 = vst.msk [vmem:[%s417_s16 + $0x10] sm:$0xff] %vm428_vm0, %v1661_v36 }
 0x1f8   : > { %v1670_v42 = vpop.f32.mrf.mxu3 }
 0x1f9   : > { %1684 = vst.msk [vmem:[%s417_s16 + $0x28] sm:$0xff] %vm428_vm0, %v1670_v42 }
 0x1fc   : > { %v1667_v14 = vpop.f32.mrf.mxu2 }
 0x1fd   : > { %1683 = vst.msk [vmem:[%s417_s16 + $0x20] sm:$0xff] %vm428_vm0, %v1667_v14 }
 0x208   : > { %v1673_v22 = vpop.f32.mrf.mxu3 }
 0x209   : > { %1685 = vst.msk [vmem:[%s417_s16 + $0x30] sm:$0xff] %vm428_vm0, %v1673_v22 }
 0x216   : > { %v1676_v37 = vpop.f32.mrf.mxu3 }
 0x217   : > { %1686 = vst.msk [vmem:[%s417_s16 + $0x38] sm:$0xff] %vm428_vm0, %v1676_v37 }
 0x218 PF: > { %s16_s25 = sadd.s32 1, %s2058_s25   ;;  %s3210_s21 = smov %s2050_s23 }
 0x219   : > { %p13_p13 = scmp.ge.s32.totalorder %s16_s25, 10   ;;  %s3211_s22 = smov %s2054_s24 }
 0x21a   : > { %s3212_s23 = smov %s3215_s26  ;;  %s3213_s24 = smov %s3219_s27 }
 0x21b   :  { %15 = sbr.rel (!%p13_p13) target bundleno = 3 (0x3), region = 80 }

</bundles_post_ra>
